<compile_context>
chip_gen: v7x
topology: tpu7x:2x2x1
jax: 0.10.0
libtpu: 0.0.40
codegen_flags: <defaults>
</compile_context>

<pallas_src>
import jax
import jax.numpy as jnp
from jax.experimental import pallas as pl
from jax.experimental.pallas import tpu as pltpu

# ---- small ViT-shaped config -------------------------------------------------
B, S, D = 2, 8, 128        # batch, sequence length, hidden size
H, HD = 4, 32              # num heads, head dim (H * HD == D)
MLP = 256                  # intermediate size
NUM_LAYERS = 2             # (ViT-base uses 12)
NUM_LABELS = 16            # classifier output dim (ViT-base uses 1000)
OUT_PAD = 128              # lane-dense padded classifier width (>= NUM_LABELS)
LN_EPS = 1e-12             # HF ViT layer_norm_eps
BS = B * S
ATTN_SCALE = 1.0 / (HD ** 0.5)


# ---- in-kernel math helpers --------------------------------------------------
def _gelu_tanh(x):
    # tanh-approximation GELU: the transcendental rides the EUP slot instead of
    # a long VALU erf polynomial.  (HF ViT uses exact erf-GELU; deviation ~1e-3.)
    c = 0.7978845608028654  # sqrt(2/pi)
    return 0.5 * x * (1.0 + jnp.tanh(c * (x + 0.044715 * x * x * x)))


def _layernorm(x, gamma, beta):
    mean = jnp.mean(x, axis=-1, keepdims=True)
    var = jnp.mean((x - mean) ** 2, axis=-1, keepdims=True)
    return (x - mean) * jax.lax.rsqrt(var + LN_EPS) * gamma + beta


# ---- fused Pallas kernel -----------------------------------------------------
def vit_fused_kernel(x_ref,
                     ln1w_ref, ln1b_ref,
                     wqkv_ref, bqkv_ref,
                     wo_ref, bo_ref,
                     ln2w_ref, ln2b_ref,
                     w1_ref, b1_ref, w2_ref, b2_ref,
                     lnfw_ref, lnfb_ref, wc_ref, bc_ref,
                     out_ref,
                     act_ref, ctx_ref):
    """Grid step (b, l): batch element b, encoder layer l.

    The layer axis is sequential ("arbitrary"); the batch axis is "parallel"
    (v7x's two TensorCores split it).  Activations (S, D) f32 stay resident in
    VMEM scratch `act_ref` across layer steps; `ctx_ref` collects per-head
    attention contexts at static lane offsets so the output projection is a
    single full-K matmul.  Matmul operands are bf16 (f32 accumulation);
    LayerNorm / softmax / GELU stay in f32 (v5e has no bf16 VPU/EUP path).
    """
    l = pl.program_id(1)

    @pl.when(l == 0)
    def _():
        act_ref[...] = x_ref[...]

    x = act_ref[...]                                              # (S, D) f32

    # --- self-attention block (pre-LN) ---
    h = _layernorm(x, ln1w_ref[...], ln1b_ref[...])
    hb = h.astype(jnp.bfloat16)
    # fused QKV: one (S, D) @ (D, 3D) MXU pass
    qkv = (jnp.dot(hb, wqkv_ref[...], preferred_element_type=jnp.float32)
           + bqkv_ref[...]).astype(jnp.bfloat16)                  # (S, 3D)

    nt_dims = (((1,), (1,)), ((), ()))                            # q @ k^T without explicit transpose
    for hi in range(H):                                           # static head loop (H is small here)
        lo = hi * HD
        qh = qkv[:, lo:lo + HD]
        kh = qkv[:, D + lo:D + lo + HD]
        vh = qkv[:, 2 * D + lo:2 * D + lo + HD]
        s = jax.lax.dot_general(qh, kh, nt_dims,
                                preferred_element_type=jnp.float32) * ATTN_SCALE
        s = s - jnp.max(s, axis=-1, keepdims=True)
        p = jnp.exp(s)
        p = p * pl.reciprocal(jnp.sum(p, axis=-1, keepdims=True), approx=True)
        ctx = jnp.dot(p.astype(jnp.bfloat16), vh,
                      preferred_element_type=jnp.float32)         # (S, HD)
        ctx_ref[:, lo:lo + HD] = ctx                              # static lane-offset store

    # single full-K output projection (K = D instead of H matmuls with K = HD)
    attn = jnp.dot(ctx_ref[...].astype(jnp.bfloat16), wo_ref[...],
                   preferred_element_type=jnp.float32)
    x1 = x + attn + bo_ref[...]                                   # residual 1

    # --- MLP block (pre-LN) ---
    h2 = _layernorm(x1, ln2w_ref[...], ln2b_ref[...])
    m = jnp.dot(h2.astype(jnp.bfloat16), w1_ref[...],
                preferred_element_type=jnp.float32) + b1_ref[...]
    m = _gelu_tanh(m)
    m = jnp.dot(m.astype(jnp.bfloat16), w2_ref[...],
                preferred_element_type=jnp.float32) + b2_ref[...]
    x2 = x1 + m                                                   # residual 2

    act_ref[...] = x2                                             # residual stream stays in VMEM

    # --- final LayerNorm + classifier, fused into the last layer step ---
    @pl.when(l == NUM_LAYERS - 1)
    def _():
        hf = _layernorm(x2, lnfw_ref[...], lnfb_ref[...])
        out_ref[...] = jnp.dot(hf.astype(jnp.bfloat16), wc_ref[...],
                               preferred_element_type=jnp.float32) + bc_ref[...]


# ---- wrapper -----------------------------------------------------------------
def _layer_spec(p):
    # stacked per-layer weight (L, a, b): grid step (b, l) gets layer l's slice
    nd = p.ndim
    return pl.BlockSpec((None,) + tuple(p.shape[1:]),
                        lambda b, l, _nd=nd: (l,) + (0,) * (_nd - 1))


def _const_spec(p):
    nd = p.ndim
    return pl.BlockSpec(tuple(p.shape), lambda b, l, _nd=nd: (0,) * _nd)


@jax.jit
def vit_forward(x, layer_stacked, head_packed):
    x2d = x.reshape(BS, D)

    in_specs = ([pl.BlockSpec((S, D), lambda b, l: (b, 0))]
                + [_layer_spec(p) for p in layer_stacked]
                + [_const_spec(p) for p in head_packed])

    out = pl.pallas_call(
        vit_fused_kernel,
        out_shape=jax.ShapeDtypeStruct((BS, OUT_PAD), jnp.float32),
        grid=(B, NUM_LAYERS),
        in_specs=in_specs,
        out_specs=pl.BlockSpec((S, OUT_PAD), lambda b, l: (b, 0)),
        scratch_shapes=[pltpu.VMEM((S, D), jnp.float32),   # residual stream
                        pltpu.VMEM((S, D), jnp.float32)],  # per-head ctx slab
        compiler_params=pltpu.CompilerParams(
            # batch axis: independent row tiles (v7x megacore); layer axis: sequential carry
            dimension_semantics=("parallel", "arbitrary"),
        ),
    )(x2d, *layer_stacked, *head_packed)

    return out.reshape(B, S, OUT_PAD)[:, :, :NUM_LABELS]


# ---- deterministic parameter init (synthetic, not a checkpoint load) ---------
# Linear weights are stored as (in, out) so the kernel computes x @ W + b,
# which is equivalent to torch's x @ W_t.T + b.
def init_params(key):
    keys = jax.random.split(key, NUM_LAYERS + 1)
    layers = []
    for li in range(NUM_LAYERS):
        ks = jax.random.split(keys[li], 6)
        layers.append([
            jnp.ones((1, D), jnp.float32),                               # ln_before gamma
            jnp.zeros((1, D), jnp.float32),                              # ln_before beta
            0.02 * jax.random.normal(ks[0], (D, D), jnp.float32),        # Wq
            jnp.zeros((1, D), jnp.float32),                              # bq
            0.02 * jax.random.normal(ks[1], (D, D), jnp.float32),        # Wk
            jnp.zeros((1, D), jnp.float32),                              # bk
            0.02 * jax.random.normal(ks[2], (D, D), jnp.float32),        # Wv
            jnp.zeros((1, D), jnp.float32),                              # bv
            0.02 * jax.random.normal(ks[3], (D, D), jnp.float32),        # Wo (attn output)
            jnp.zeros((1, D), jnp.float32),                              # bo
            jnp.ones((1, D), jnp.float32),                               # ln_after gamma
            jnp.zeros((1, D), jnp.float32),                              # ln_after beta
            0.02 * jax.random.normal(ks[4], (D, MLP), jnp.float32),      # W_intermediate
            jnp.zeros((1, MLP), jnp.float32),                            # b_intermediate
            0.02 * jax.random.normal(ks[5], (MLP, D), jnp.float32),      # W_output
            jnp.zeros((1, D), jnp.float32),                              # b_output
        ])
    kh = keys[-1]
    head = [
        jnp.ones((1, D), jnp.float32),                                   # final LN gamma
        jnp.zeros((1, D), jnp.float32),                                  # final LN beta
        0.02 * jax.random.normal(kh, (D, NUM_LABELS), jnp.float32),      # classifier W
        jnp.zeros((1, NUM_LABELS), jnp.float32),                         # classifier b
    ]
    return layers, head


def pack_params(layers_f32, head_f32):
    """Fuse Wq/Wk/Wv into a single (D, 3D) weight, cast matmul weights to bf16,
    stack per-layer weights on a leading layer axis, pad the classifier to a
    lane-dense (D, 128) slab."""
    per_layer = []
    for (ln1w, ln1b, wq, bq, wk, bk, wv, bv, wo, bo,
         ln2w, ln2b, w1, b1, w2, b2) in layers_f32:
        wqkv = jnp.concatenate([wq, wk, wv], axis=-1).astype(jnp.bfloat16)   # (D, 3D)
        bqkv = jnp.concatenate([bq, bk, bv], axis=-1)                        # (1, 3D) f32
        per_layer.append([
            ln1w, ln1b,
            wqkv, bqkv,
            wo.astype(jnp.bfloat16), bo,
            ln2w, ln2b,
            w1.astype(jnp.bfloat16), b1,
            w2.astype(jnp.bfloat16), b2,
        ])
    stacked = [jnp.stack([layer[i] for layer in per_layer], axis=0)
               for i in range(len(per_layer[0]))]

    lnfw, lnfb, wc, bc = head_f32
    wc_pad = jnp.zeros((D, OUT_PAD), jnp.float32).at[:, :NUM_LABELS].set(wc).astype(jnp.bfloat16)
    bc_pad = jnp.zeros((1, OUT_PAD), jnp.float32).at[:, :NUM_LABELS].set(bc)
    return stacked, [lnfw, lnfb, wc_pad, bc_pad]


# ---- pure-JAX f32 reference (for correctness check) --------------------------
def reference_forward(x, layers, head):
    def ln(t, g, b):
        mu = jnp.mean(t, axis=-1, keepdims=True)
        var = jnp.mean((t - mu) ** 2, axis=-1, keepdims=True)
        return (t - mu) / jnp.sqrt(var + LN_EPS) * g + b

    for (ln1w, ln1b, wq, bq, wk, bk, wv, bv, wo, bo,
         ln2w, ln2b, w1, b1, w2, b2) in layers:
        h = ln(x, ln1w, ln1b)
        q = (h @ wq + bq).reshape(B, S, H, HD)
        k = (h @ wk + bk).reshape(B, S, H, HD)
        v = (h @ wv + bv).reshape(B, S, H, HD)
        s = jnp.einsum('bqhe,bkhe->bhqk', q, k) * ATTN_SCALE
        p = jax.nn.softmax(s, axis=-1)
        ctx = jnp.einsum('bhqk,bkhe->bqhe', p, v).reshape(B, S, D)
        x = x + ctx @ wo + bo
        h2 = ln(x, ln2w, ln2b)
        m = h2 @ w1 + b1
        m = 0.5 * m * (1.0 + jax.lax.erf(m * 0.7071067811865476))   # exact GELU (HF)
        x = x + m @ w2 + b2
    lnfw, lnfb, wc, bc = head
    return ln(x, lnfw, lnfb) @ wc + bc


if __name__ == "__main__":
    key = jax.random.PRNGKey(0)
    kx, kp = jax.random.split(key)
    x = jax.random.normal(kx, (B, S, D), dtype=jnp.float32)

    layers_f32, head_f32 = init_params(kp)
    layer_stacked, head_packed = pack_params(layers_f32, head_f32)

    out = vit_forward(x, layer_stacked, head_packed)
    out = jax.block_until_ready(out)

    assert out.shape == (B, S, NUM_LABELS), out.shape
    assert bool(jnp.all(jnp.isfinite(out)))

    ref = reference_forward(x, layers_f32, head_f32)
    max_err = float(jnp.max(jnp.abs(out - ref)))
    assert max_err < 5e-2, f"max abs err vs f32 reference: {max_err}"

    print("KERNEL_OK")
</pallas_src>

<mosaic_0001>
module attributes {stable_mosaic.version = 11 : i64} {
  func.func @vit_fused_kernel(%arg0: i32, %arg1: i32, %arg2: memref<8x128xf32, #tpu.memory_space<vmem>>, %arg3: memref<1x1x128xf32, #tpu.memory_space<vmem>>, %arg4: memref<1x1x128xf32, #tpu.memory_space<vmem>>, %arg5: memref<1x128x384xbf16, #tpu.memory_space<vmem>>, %arg6: memref<1x1x384xf32, #tpu.memory_space<vmem>>, %arg7: memref<1x128x128xbf16, #tpu.memory_space<vmem>>, %arg8: memref<1x1x128xf32, #tpu.memory_space<vmem>>, %arg9: memref<1x1x128xf32, #tpu.memory_space<vmem>>, %arg10: memref<1x1x128xf32, #tpu.memory_space<vmem>>, %arg11: memref<1x128x256xbf16, #tpu.memory_space<vmem>>, %arg12: memref<1x1x256xf32, #tpu.memory_space<vmem>>, %arg13: memref<1x256x128xbf16, #tpu.memory_space<vmem>>, %arg14: memref<1x1x128xf32, #tpu.memory_space<vmem>>, %arg15: memref<1x128xf32, #tpu.memory_space<vmem>>, %arg16: memref<1x128xf32, #tpu.memory_space<vmem>>, %arg17: memref<128x128xbf16, #tpu.memory_space<vmem>>, %arg18: memref<1x128xf32, #tpu.memory_space<vmem>>, %arg19: memref<8x128xf32, #tpu.memory_space<vmem>>, %arg20: memref<8x128xf32, #tpu.memory_space<vmem>>, %arg21: memref<8x128xf32, #tpu.memory_space<vmem>>) attributes {dimension_semantics = [#tpu.dimension_semantics<parallel>, #tpu.dimension_semantics<arbitrary>], iteration_bounds = array<i64: 2, 2>, scalar_prefetch = 0 : i64, scratch_operands = 2 : i64, tpu.core_type = #tpu.core_type<tc>, window_params = [{transform_indices = @transform_0, window_bounds = array<i64: 8, 128>}, {transform_indices = @transform_1, window_bounds = array<i64: 1, 1, 128>}, {transform_indices = @transform_2, window_bounds = array<i64: 1, 1, 128>}, {transform_indices = @transform_3, window_bounds = array<i64: 1, 128, 384>}, {transform_indices = @transform_4, window_bounds = array<i64: 1, 1, 384>}, {transform_indices = @transform_5, window_bounds = array<i64: 1, 128, 128>}, {transform_indices = @transform_6, window_bounds = array<i64: 1, 1, 128>}, {transform_indices = @transform_7, window_bounds = array<i64: 1, 1, 128>}, {transform_indices = @transform_8, window_bounds = array<i64: 1, 1, 128>}, {transform_indices = @transform_9, window_bounds = array<i64: 1, 128, 256>}, {transform_indices = @transform_10, window_bounds = array<i64: 1, 1, 256>}, {transform_indices = @transform_11, window_bounds = array<i64: 1, 256, 128>}, {transform_indices = @transform_12, window_bounds = array<i64: 1, 1, 128>}, {pipeline_mode = #tpu.pipeline_mode<synchronous>, transform_indices = @transform_13, window_bounds = array<i64: 1, 128>}, {pipeline_mode = #tpu.pipeline_mode<synchronous>, transform_indices = @transform_14, window_bounds = array<i64: 1, 128>}, {pipeline_mode = #tpu.pipeline_mode<synchronous>, transform_indices = @transform_15, window_bounds = array<i64: 128, 128>}, {pipeline_mode = #tpu.pipeline_mode<synchronous>, transform_indices = @transform_16, window_bounds = array<i64: 1, 128>}, {transform_indices = @transform_17, window_bounds = array<i64: 8, 128>}]} {
    %c0_i32 = arith.constant 0 : i32
    %0 = arith.cmpi eq, %arg1, %c0_i32 : i32
    %1 = arith.extui %0 : i1 to i32
    %c0_i32_0 = arith.constant 0 : i32
    %2 = arith.cmpi ne, %1, %c0_i32_0 : i32
    scf.if %2 {
      %c0_85 = arith.constant 0 : index
      %c0_86 = arith.constant 0 : index
      %185 = vector.load %arg2[%c0_85, %c0_86] : memref<8x128xf32, #tpu.memory_space<vmem>>, vector<8x128xf32>
      %c0_87 = arith.constant 0 : index
      %c0_88 = arith.constant 0 : index
      %186 = vector.load %arg20[%c0_87, %c0_88] : memref<8x128xf32, #tpu.memory_space<vmem>>, vector<8x128xf32>
      tpu.vector_store %arg20[%c0_87, %c0_88], %185 {strides = array<i32>} : memref<8x128xf32, #tpu.memory_space<vmem>>, vector<8x128xf32>,
    } else {
    }
    %c0 = arith.constant 0 : index
    %c0_1 = arith.constant 0 : index
    %3 = vector.load %arg20[%c0, %c0_1] : memref<8x128xf32, #tpu.memory_space<vmem>>, vector<8x128xf32>
    %c0_2 = arith.constant 0 : index
    %c0_3 = arith.constant 0 : index
    %c0_4 = arith.constant 0 : index
    %4 = vector.load %arg3[%c0_2, %c0_3, %c0_4] : memref<1x1x128xf32, #tpu.memory_space<vmem>>, vector<1x1x128xf32>
    %5 = vector.shape_cast %4 : vector<1x1x128xf32> to vector<1x128xf32>
    %c0_5 = arith.constant 0 : index
    %c0_6 = arith.constant 0 : index
    %c0_7 = arith.constant 0 : index
    %6 = vector.load %arg4[%c0_5, %c0_6, %c0_7] : memref<1x1x128xf32, #tpu.memory_space<vmem>>, vector<1x1x128xf32>
    %7 = vector.shape_cast %6 : vector<1x1x128xf32> to vector<1x128xf32>
    %cst = arith.constant dense<0.000000e+00> : vector<8xf32>
    %8 = vector.multi_reduction <add>, %3, %cst [1] : vector<8x128xf32> to vector<8xf32>
    %9 = vector.shape_cast %8 : vector<8xf32> to vector<8x1xf32>
    %cst_8 = arith.constant 1.280000e+02 : f32
    %10 = vector.broadcast %cst_8 : f32 to vector<8x1xf32>
    %11 = arith.divf %9, %10 : vector<8x1xf32>
    %12 = vector.broadcast %11 : vector<8x1xf32> to vector<8x128xf32>
    %13 = arith.subf %3, %12 : vector<8x128xf32>
    %14 = arith.mulf %13, %13 : vector<8x128xf32>
    %cst_9 = arith.constant dense<0.000000e+00> : vector<8xf32>
    %15 = vector.multi_reduction <add>, %14, %cst_9 [1] : vector<8x128xf32> to vector<8xf32>
    %16 = vector.shape_cast %15 : vector<8xf32> to vector<8x1xf32>
    %cst_10 = arith.constant 1.280000e+02 : f32
    %17 = vector.broadcast %cst_10 : f32 to vector<8x1xf32>
    %18 = arith.divf %16, %17 : vector<8x1xf32>
    %19 = vector.broadcast %11 : vector<8x1xf32> to vector<8x128xf32>
    %20 = arith.subf %3, %19 : vector<8x128xf32>
    %cst_11 = arith.constant 9.99999996E-13 : f32
    %21 = vector.broadcast %cst_11 : f32 to vector<8x1xf32>
    %22 = arith.addf %18, %21 : vector<8x1xf32>
    %23 = math.rsqrt %22 : vector<8x1xf32>
    %24 = vector.broadcast %23 : vector<8x1xf32> to vector<8x128xf32>
    %25 = arith.mulf %20, %24 : vector<8x128xf32>
    %26 = vector.broadcast %5 : vector<1x128xf32> to vector<8x128xf32>
    %27 = arith.mulf %25, %26 : vector<8x128xf32>
    %28 = vector.broadcast %7 : vector<1x128xf32> to vector<8x128xf32>
    %29 = arith.addf %27, %28 : vector<8x128xf32>
    %30 = arith.truncf %29 : vector<8x128xf32> to vector<8x128xbf16>
    %c0_12 = arith.constant 0 : index
    %c0_13 = arith.constant 0 : index
    %c0_14 = arith.constant 0 : index
    %31 = vector.load %arg5[%c0_12, %c0_13, %c0_14] : memref<1x128x384xbf16, #tpu.memory_space<vmem>>, vector<1x128x384xbf16>
    %32 = vector.shape_cast %31 : vector<1x128x384xbf16> to vector<128x384xbf16>
    %cst_15 = arith.constant dense<0.000000e+00> : vector<8x384xf32>
    %33 = tpu.matmul %30, %32, %cst_15 {dimension_numbers = #tpu.dot_dimension_numbers<[1], [0], [0], [1], [0, 0, 1, 1], [], []>} : vector<8x128xbf16>, vector<128x384xbf16>, vector<8x384xf32> -> vector<8x384xf32>
    %c0_16 = arith.constant 0 : index
    %c0_17 = arith.constant 0 : index
    %c0_18 = arith.constant 0 : index
    %34 = vector.load %arg6[%c0_16, %c0_17, %c0_18] : memref<1x1x384xf32, #tpu.memory_space<vmem>>, vector<1x1x384xf32>
    %35 = vector.shape_cast %34 : vector<1x1x384xf32> to vector<1x384xf32>
    %36 = vector.broadcast %35 : vector<1x384xf32> to vector<8x384xf32>
    %37 = arith.addf %33, %36 : vector<8x384xf32>
    %38 = arith.truncf %37 : vector<8x384xf32> to vector<8x384xbf16>
    %39 = vector.extract_strided_slice %38 {offsets = [0, 0], sizes = [8, 32], strides = [1, 1]} : vector<8x384xbf16> to vector<8x32xbf16>
    %40 = vector.extract_strided_slice %38 {offsets = [0, 128], sizes = [8, 32], strides = [1, 1]} : vector<8x384xbf16> to vector<8x32xbf16>
    %41 = vector.extract_strided_slice %38 {offsets = [0, 256], sizes = [8, 32], strides = [1, 1]} : vector<8x384xbf16> to vector<8x32xbf16>
    %cst_19 = arith.constant dense<0.000000e+00> : vector<8x8xf32>
    %42 = tpu.matmul %39, %40, %cst_19 {dimension_numbers = #tpu.dot_dimension_numbers<[1], [1], [0], [0], [0, 0, 1, 0], [], []>} : vector<8x32xbf16>, vector<8x32xbf16>, vector<8x8xf32> -> vector<8x8xf32>
    %cst_20 = arith.constant 0.176776692 : f32
    %43 = vector.broadcast %cst_20 : f32 to vector<8x8xf32>
    %44 = arith.mulf %42, %43 : vector<8x8xf32>
    %cst_21 = arith.constant dense<0xFF800000> : vector<8xf32>
    %45 = vector.multi_reduction <maximumf>, %44, %cst_21 [1] : vector<8x8xf32> to vector<8xf32>
    %46 = vector.shape_cast %45 : vector<8xf32> to vector<8x1xf32>
    %47 = vector.broadcast %46 : vector<8x1xf32> to vector<8x8xf32>
    %48 = arith.subf %44, %47 : vector<8x8xf32>
    %49 = math.exp %48 : vector<8x8xf32>
    %cst_22 = arith.constant dense<0.000000e+00> : vector<8xf32>
    %50 = vector.multi_reduction <add>, %49, %cst_22 [1] : vector<8x8xf32> to vector<8xf32>
    %51 = vector.shape_cast %50 : vector<8xf32> to vector<8x1xf32>
    %52 = tpu.reciprocal %51 {approx = true} : vector<8x1xf32> -> vector<8x1xf32>
    %53 = vector.broadcast %52 : vector<8x1xf32> to vector<8x8xf32>
    %54 = arith.mulf %49, %53 : vector<8x8xf32>
    %55 = arith.truncf %54 : vector<8x8xf32> to vector<8x8xbf16>
    %cst_23 = arith.constant dense<0.000000e+00> : vector<8x32xf32>
    %56 = tpu.matmul %55, %41, %cst_23 {dimension_numbers = #tpu.dot_dimension_numbers<[1], [0], [0], [1], [0, 0, 1, 1], [], []>} : vector<8x8xbf16>, vector<8x32xbf16>, vector<8x32xf32> -> vector<8x32xf32>
    %c0_24 = arith.constant 0 : index
    %c0_25 = arith.constant 0 : index
    %57 = vector.load %arg21[%c0_24, %c0_25] : memref<8x128xf32, #tpu.memory_space<vmem>>, vector<8x32xf32>
    tpu.vector_store %arg21[%c0_24, %c0_25], %56 {strides = array<i32>} : memref<8x128xf32, #tpu.memory_space<vmem>>, vector<8x32xf32>,
    %58 = vector.extract_strided_slice %38 {offsets = [0, 32], sizes = [8, 32], strides = [1, 1]} : vector<8x384xbf16> to vector<8x32xbf16>
    %59 = vector.extract_strided_slice %38 {offsets = [0, 160], sizes = [8, 32], strides = [1, 1]} : vector<8x384xbf16> to vector<8x32xbf16>
    %60 = vector.extract_strided_slice %38 {offsets = [0, 288], sizes = [8, 32], strides = [1, 1]} : vector<8x384xbf16> to vector<8x32xbf16>
    %cst_26 = arith.constant dense<0.000000e+00> : vector<8x8xf32>
    %61 = tpu.matmul %58, %59, %cst_26 {dimension_numbers = #tpu.dot_dimension_numbers<[1], [1], [0], [0], [0, 0, 1, 0], [], []>} : vector<8x32xbf16>, vector<8x32xbf16>, vector<8x8xf32> -> vector<8x8xf32>
    %cst_27 = arith.constant 0.176776692 : f32
    %62 = vector.broadcast %cst_27 : f32 to vector<8x8xf32>
    %63 = arith.mulf %61, %62 : vector<8x8xf32>
    %cst_28 = arith.constant dense<0xFF800000> : vector<8xf32>
    %64 = vector.multi_reduction <maximumf>, %63, %cst_28 [1] : vector<8x8xf32> to vector<8xf32>
    %65 = vector.shape_cast %64 : vector<8xf32> to vector<8x1xf32>
    %66 = vector.broadcast %65 : vector<8x1xf32> to vector<8x8xf32>
    %67 = arith.subf %63, %66 : vector<8x8xf32>
    %68 = math.exp %67 : vector<8x8xf32>
    %cst_29 = arith.constant dense<0.000000e+00> : vector<8xf32>
    %69 = vector.multi_reduction <add>, %68, %cst_29 [1] : vector<8x8xf32> to vector<8xf32>
    %70 = vector.shape_cast %69 : vector<8xf32> to vector<8x1xf32>
    %71 = tpu.reciprocal %70 {approx = true} : vector<8x1xf32> -> vector<8x1xf32>
    %72 = vector.broadcast %71 : vector<8x1xf32> to vector<8x8xf32>
    %73 = arith.mulf %68, %72 : vector<8x8xf32>
    %74 = arith.truncf %73 : vector<8x8xf32> to vector<8x8xbf16>
    %cst_30 = arith.constant dense<0.000000e+00> : vector<8x32xf32>
    %75 = tpu.matmul %74, %60, %cst_30 {dimension_numbers = #tpu.dot_dimension_numbers<[1], [0], [0], [1], [0, 0, 1, 1], [], []>} : vector<8x8xbf16>, vector<8x32xbf16>, vector<8x32xf32> -> vector<8x32xf32>
    %c0_31 = arith.constant 0 : index
    %c32 = arith.constant 32 : index
    %76 = vector.load %arg21[%c0_31, %c32] : memref<8x128xf32, #tpu.memory_space<vmem>>, vector<8x32xf32>
    tpu.vector_store %arg21[%c0_31, %c32], %75 {strides = array<i32>} : memref<8x128xf32, #tpu.memory_space<vmem>>, vector<8x32xf32>,
    %77 = vector.extract_strided_slice %38 {offsets = [0, 64], sizes = [8, 32], strides = [1, 1]} : vector<8x384xbf16> to vector<8x32xbf16>
    %78 = vector.extract_strided_slice %38 {offsets = [0, 192], sizes = [8, 32], strides = [1, 1]} : vector<8x384xbf16> to vector<8x32xbf16>
    %79 = vector.extract_strided_slice %38 {offsets = [0, 320], sizes = [8, 32], strides = [1, 1]} : vector<8x384xbf16> to vector<8x32xbf16>
    %cst_32 = arith.constant dense<0.000000e+00> : vector<8x8xf32>
    %80 = tpu.matmul %77, %78, %cst_32 {dimension_numbers = #tpu.dot_dimension_numbers<[1], [1], [0], [0], [0, 0, 1, 0], [], []>} : vector<8x32xbf16>, vector<8x32xbf16>, vector<8x8xf32> -> vector<8x8xf32>
    %cst_33 = arith.constant 0.176776692 : f32
    %81 = vector.broadcast %cst_33 : f32 to vector<8x8xf32>
    %82 = arith.mulf %80, %81 : vector<8x8xf32>
    %cst_34 = arith.constant dense<0xFF800000> : vector<8xf32>
    %83 = vector.multi_reduction <maximumf>, %82, %cst_34 [1] : vector<8x8xf32> to vector<8xf32>
    %84 = vector.shape_cast %83 : vector<8xf32> to vector<8x1xf32>
    %85 = vector.broadcast %84 : vector<8x1xf32> to vector<8x8xf32>
    %86 = arith.subf %82, %85 : vector<8x8xf32>
    %87 = math.exp %86 : vector<8x8xf32>
    %cst_35 = arith.constant dense<0.000000e+00> : vector<8xf32>
    %88 = vector.multi_reduction <add>, %87, %cst_35 [1] : vector<8x8xf32> to vector<8xf32>
    %89 = vector.shape_cast %88 : vector<8xf32> to vector<8x1xf32>
    %90 = tpu.reciprocal %89 {approx = true} : vector<8x1xf32> -> vector<8x1xf32>
    %91 = vector.broadcast %90 : vector<8x1xf32> to vector<8x8xf32>
    %92 = arith.mulf %87, %91 : vector<8x8xf32>
    %93 = arith.truncf %92 : vector<8x8xf32> to vector<8x8xbf16>
    %cst_36 = arith.constant dense<0.000000e+00> : vector<8x32xf32>
    %94 = tpu.matmul %93, %79, %cst_36 {dimension_numbers = #tpu.dot_dimension_numbers<[1], [0], [0], [1], [0, 0, 1, 1], [], []>} : vector<8x8xbf16>, vector<8x32xbf16>, vector<8x32xf32> -> vector<8x32xf32>
    %c0_37 = arith.constant 0 : index
    %c64 = arith.constant 64 : index
    %95 = vector.load %arg21[%c0_37, %c64] : memref<8x128xf32, #tpu.memory_space<vmem>>, vector<8x32xf32>
    tpu.vector_store %arg21[%c0_37, %c64], %94 {strides = array<i32>} : memref<8x128xf32, #tpu.memory_space<vmem>>, vector<8x32xf32>,
    %96 = vector.extract_strided_slice %38 {offsets = [0, 96], sizes = [8, 32], strides = [1, 1]} : vector<8x384xbf16> to vector<8x32xbf16>
    %97 = vector.extract_strided_slice %38 {offsets = [0, 224], sizes = [8, 32], strides = [1, 1]} : vector<8x384xbf16> to vector<8x32xbf16>
    %98 = vector.extract_strided_slice %38 {offsets = [0, 352], sizes = [8, 32], strides = [1, 1]} : vector<8x384xbf16> to vector<8x32xbf16>
    %cst_38 = arith.constant dense<0.000000e+00> : vector<8x8xf32>
    %99 = tpu.matmul %96, %97, %cst_38 {dimension_numbers = #tpu.dot_dimension_numbers<[1], [1], [0], [0], [0, 0, 1, 0], [], []>} : vector<8x32xbf16>, vector<8x32xbf16>, vector<8x8xf32> -> vector<8x8xf32>
    %cst_39 = arith.constant 0.176776692 : f32
    %100 = vector.broadcast %cst_39 : f32 to vector<8x8xf32>
    %101 = arith.mulf %99, %100 : vector<8x8xf32>
    %cst_40 = arith.constant dense<0xFF800000> : vector<8xf32>
    %102 = vector.multi_reduction <maximumf>, %101, %cst_40 [1] : vector<8x8xf32> to vector<8xf32>
    %103 = vector.shape_cast %102 : vector<8xf32> to vector<8x1xf32>
    %104 = vector.broadcast %103 : vector<8x1xf32> to vector<8x8xf32>
    %105 = arith.subf %101, %104 : vector<8x8xf32>
    %106 = math.exp %105 : vector<8x8xf32>
    %cst_41 = arith.constant dense<0.000000e+00> : vector<8xf32>
    %107 = vector.multi_reduction <add>, %106, %cst_41 [1] : vector<8x8xf32> to vector<8xf32>
    %108 = vector.shape_cast %107 : vector<8xf32> to vector<8x1xf32>
    %109 = tpu.reciprocal %108 {approx = true} : vector<8x1xf32> -> vector<8x1xf32>
    %110 = vector.broadcast %109 : vector<8x1xf32> to vector<8x8xf32>
    %111 = arith.mulf %106, %110 : vector<8x8xf32>
    %112 = arith.truncf %111 : vector<8x8xf32> to vector<8x8xbf16>
    %cst_42 = arith.constant dense<0.000000e+00> : vector<8x32xf32>
    %113 = tpu.matmul %112, %98, %cst_42 {dimension_numbers = #tpu.dot_dimension_numbers<[1], [0], [0], [1], [0, 0, 1, 1], [], []>} : vector<8x8xbf16>, vector<8x32xbf16>, vector<8x32xf32> -> vector<8x32xf32>
    %c0_43 = arith.constant 0 : index
    %c96 = arith.constant 96 : index
    %114 = vector.load %arg21[%c0_43, %c96] : memref<8x128xf32, #tpu.memory_space<vmem>>, vector<8x32xf32>
    tpu.vector_store %arg21[%c0_43, %c96], %113 {strides = array<i32>} : memref<8x128xf32, #tpu.memory_space<vmem>>, vector<8x32xf32>,
    %c0_44 = arith.constant 0 : index
    %c0_45 = arith.constant 0 : index
    %115 = vector.load %arg21[%c0_44, %c0_45] : memref<8x128xf32, #tpu.memory_space<vmem>>, vector<8x128xf32>
    %116 = arith.truncf %115 : vector<8x128xf32> to vector<8x128xbf16>
    %c0_46 = arith.constant 0 : index
    %c0_47 = arith.constant 0 : index
    %c0_48 = arith.constant 0 : index
    %117 = vector.load %arg7[%c0_46, %c0_47, %c0_48] : memref<1x128x128xbf16, #tpu.memory_space<vmem>>, vector<1x128x128xbf16>
    %118 = vector.shape_cast %117 : vector<1x128x128xbf16> to vector<128x128xbf16>
    %cst_49 = arith.constant dense<0.000000e+00> : vector<8x128xf32>
    %119 = tpu.matmul %116, %118, %cst_49 {dimension_numbers = #tpu.dot_dimension_numbers<[1], [0], [0], [1], [0, 0, 1, 1], [], []>} : vector<8x128xbf16>, vector<128x128xbf16>, vector<8x128xf32> -> vector<8x128xf32>
    %120 = arith.addf %3, %119 : vector<8x128xf32>
    %c0_50 = arith.constant 0 : index
    %c0_51 = arith.constant 0 : index
    %c0_52 = arith.constant 0 : index
    %121 = vector.load %arg8[%c0_50, %c0_51, %c0_52] : memref<1x1x128xf32, #tpu.memory_space<vmem>>, vector<1x1x128xf32>
    %122 = vector.shape_cast %121 : vector<1x1x128xf32> to vector<1x128xf32>
    %123 = vector.broadcast %122 : vector<1x128xf32> to vector<8x128xf32>
    %124 = arith.addf %120, %123 : vector<8x128xf32>
    %c0_53 = arith.constant 0 : index
    %c0_54 = arith.constant 0 : index
    %c0_55 = arith.constant 0 : index
    %125 = vector.load %arg9[%c0_53, %c0_54, %c0_55] : memref<1x1x128xf32, #tpu.memory_space<vmem>>, vector<1x1x128xf32>
    %126 = vector.shape_cast %125 : vector<1x1x128xf32> to vector<1x128xf32>
    %c0_56 = arith.constant 0 : index
    %c0_57 = arith.constant 0 : index
    %c0_58 = arith.constant 0 : index
    %127 = vector.load %arg10[%c0_56, %c0_57, %c0_58] : memref<1x1x128xf32, #tpu.memory_space<vmem>>, vector<1x1x128xf32>
    %128 = vector.shape_cast %127 : vector<1x1x128xf32> to vector<1x128xf32>
    %cst_59 = arith.constant dense<0.000000e+00> : vector<8xf32>
    %129 = vector.multi_reduction <add>, %124, %cst_59 [1] : vector<8x128xf32> to vector<8xf32>
    %130 = vector.shape_cast %129 : vector<8xf32> to vector<8x1xf32>
    %cst_60 = arith.constant 1.280000e+02 : f32
    %131 = vector.broadcast %cst_60 : f32 to vector<8x1xf32>
    %132 = arith.divf %130, %131 : vector<8x1xf32>
    %133 = vector.broadcast %132 : vector<8x1xf32> to vector<8x128xf32>
    %134 = arith.subf %124, %133 : vector<8x128xf32>
    %135 = arith.mulf %134, %134 : vector<8x128xf32>
    %cst_61 = arith.constant dense<0.000000e+00> : vector<8xf32>
    %136 = vector.multi_reduction <add>, %135, %cst_61 [1] : vector<8x128xf32> to vector<8xf32>
    %137 = vector.shape_cast %136 : vector<8xf32> to vector<8x1xf32>
    %cst_62 = arith.constant 1.280000e+02 : f32
    %138 = vector.broadcast %cst_62 : f32 to vector<8x1xf32>
    %139 = arith.divf %137, %138 : vector<8x1xf32>
    %140 = vector.broadcast %132 : vector<8x1xf32> to vector<8x128xf32>
    %141 = arith.subf %124, %140 : vector<8x128xf32>
    %cst_63 = arith.constant 9.99999996E-13 : f32
    %142 = vector.broadcast %cst_63 : f32 to vector<8x1xf32>
    %143 = arith.addf %139, %142 : vector<8x1xf32>
    %144 = math.rsqrt %143 : vector<8x1xf32>
    %145 = vector.broadcast %144 : vector<8x1xf32> to vector<8x128xf32>
    %146 = arith.mulf %141, %145 : vector<8x128xf32>
    %147 = vector.broadcast %126 : vector<1x128xf32> to vector<8x128xf32>
    %148 = arith.mulf %146, %147 : vector<8x128xf32>
    %149 = vector.broadcast %128 : vector<1x128xf32> to vector<8x128xf32>
    %150 = arith.addf %148, %149 : vector<8x128xf32>
    %151 = arith.truncf %150 : vector<8x128xf32> to vector<8x128xbf16>
    %c0_64 = arith.constant 0 : index
    %c0_65 = arith.constant 0 : index
    %c0_66 = arith.constant 0 : index
    %152 = vector.load %arg11[%c0_64, %c0_65, %c0_66] : memref<1x128x256xbf16, #tpu.memory_space<vmem>>, vector<1x128x256xbf16>
    %153 = vector.shape_cast %152 : vector<1x128x256xbf16> to vector<128x256xbf16>
    %cst_67 = arith.constant dense<0.000000e+00> : vector<8x256xf32>
    %154 = tpu.matmul %151, %153, %cst_67 {dimension_numbers = #tpu.dot_dimension_numbers<[1], [0], [0], [1], [0, 0, 1, 1], [], []>} : vector<8x128xbf16>, vector<128x256xbf16>, vector<8x256xf32> -> vector<8x256xf32>
    %c0_68 = arith.constant 0 : index
    %c0_69 = arith.constant 0 : index
    %c0_70 = arith.constant 0 : index
    %155 = vector.load %arg12[%c0_68, %c0_69, %c0_70] : memref<1x1x256xf32, #tpu.memory_space<vmem>>, vector<1x1x256xf32>
    %156 = vector.shape_cast %155 : vector<1x1x256xf32> to vector<1x256xf32>
    %157 = vector.broadcast %156 : vector<1x256xf32> to vector<8x256xf32>
    %158 = arith.addf %154, %157 : vector<8x256xf32>
    %cst_71 = arith.constant 5.000000e-01 : f32
    %159 = vector.broadcast %cst_71 : f32 to vector<8x256xf32>
    %160 = arith.mulf %159, %158 : vector<8x256xf32>
    %cst_72 = arith.constant 4.471500e-02 : f32
    %161 = vector.broadcast %cst_72 : f32 to vector<8x256xf32>
    %162 = arith.mulf %161, %158 : vector<8x256xf32>
    %163 = arith.mulf %162, %158 : vector<8x256xf32>
    %164 = arith.mulf %163, %158 : vector<8x256xf32>
    %165 = arith.addf %158, %164 : vector<8x256xf32>
    %cst_73 = arith.constant 0.797884583 : f32
    %166 = vector.broadcast %cst_73 : f32 to vector<8x256xf32>
    %167 = arith.mulf %166, %165 : vector<8x256xf32>
    %168 = math.tanh %167 : vector<8x256xf32>
    %cst_74 = arith.constant 1.000000e+00 : f32
    %169 = vector.broadcast %cst_74 : f32 to vector<8x256xf32>
    %170 = arith.addf %169, %168 : vector<8x256xf32>
    %171 = arith.mulf %160, %170 : vector<8x256xf32>
    %172 = arith.truncf %171 : vector<8x256xf32> to vector<8x256xbf16>
    %c0_75 = arith.constant 0 : index
    %c0_76 = arith.constant 0 : index
    %c0_77 = arith.constant 0 : index
    %173 = vector.load %arg13[%c0_75, %c0_76, %c0_77] : memref<1x256x128xbf16, #tpu.memory_space<vmem>>, vector<1x256x128xbf16>
    %174 = vector.shape_cast %173 : vector<1x256x128xbf16> to vector<256x128xbf16>
    %cst_78 = arith.constant dense<0.000000e+00> : vector<8x128xf32>
    %175 = tpu.matmul %172, %174, %cst_78 {dimension_numbers = #tpu.dot_dimension_numbers<[1], [0], [0], [1], [0, 0, 1, 1], [], []>} : vector<8x256xbf16>, vector<256x128xbf16>, vector<8x128xf32> -> vector<8x128xf32>
    %c0_79 = arith.constant 0 : index
    %c0_80 = arith.constant 0 : index
    %c0_81 = arith.constant 0 : index
    %176 = vector.load %arg14[%c0_79, %c0_80, %c0_81] : memref<1x1x128xf32, #tpu.memory_space<vmem>>, vector<1x1x128xf32>
    %177 = vector.shape_cast %176 : vector<1x1x128xf32> to vector<1x128xf32>
    %178 = vector.broadcast %177 : vector<1x128xf32> to vector<8x128xf32>
    %179 = arith.addf %175, %178 : vector<8x128xf32>
    %180 = arith.addf %124, %179 : vector<8x128xf32>
    %c0_82 = arith.constant 0 : index
    %c0_83 = arith.constant 0 : index
    %181 = vector.load %arg20[%c0_82, %c0_83] : memref<8x128xf32, #tpu.memory_space<vmem>>, vector<8x128xf32>
    tpu.vector_store %arg20[%c0_82, %c0_83], %180 {strides = array<i32>} : memref<8x128xf32, #tpu.memory_space<vmem>>, vector<8x128xf32>,
    %c1_i32 = arith.constant 1 : i32
    %182 = arith.cmpi eq, %arg1, %c1_i32 : i32
    %183 = arith.extui %182 : i1 to i32
    %c0_i32_84 = arith.constant 0 : i32
    %184 = arith.cmpi ne, %183, %c0_i32_84 : i32
    scf.if %184 {
      %c0_85 = arith.constant 0 : index
      %c0_86 = arith.constant 0 : index
      %185 = vector.load %arg15[%c0_85, %c0_86] : memref<1x128xf32, #tpu.memory_space<vmem>>, vector<1x128xf32>
      %c0_87 = arith.constant 0 : index
      %c0_88 = arith.constant 0 : index
      %186 = vector.load %arg16[%c0_87, %c0_88] : memref<1x128xf32, #tpu.memory_space<vmem>>, vector<1x128xf32>
      %cst_89 = arith.constant dense<0.000000e+00> : vector<8xf32>
      %187 = vector.multi_reduction <add>, %180, %cst_89 [1] : vector<8x128xf32> to vector<8xf32>
      %188 = vector.shape_cast %187 : vector<8xf32> to vector<8x1xf32>
      %cst_90 = arith.constant 1.280000e+02 : f32
      %189 = vector.broadcast %cst_90 : f32 to vector<8x1xf32>
      %190 = arith.divf %188, %189 : vector<8x1xf32>
      %191 = vector.broadcast %190 : vector<8x1xf32> to vector<8x128xf32>
      %192 = arith.subf %180, %191 : vector<8x128xf32>
      %193 = arith.mulf %192, %192 : vector<8x128xf32>
      %cst_91 = arith.constant dense<0.000000e+00> : vector<8xf32>
      %194 = vector.multi_reduction <add>, %193, %cst_91 [1] : vector<8x128xf32> to vector<8xf32>
      %195 = vector.shape_cast %194 : vector<8xf32> to vector<8x1xf32>
      %cst_92 = arith.constant 1.280000e+02 : f32
      %196 = vector.broadcast %cst_92 : f32 to vector<8x1xf32>
      %197 = arith.divf %195, %196 : vector<8x1xf32>
      %198 = vector.broadcast %190 : vector<8x1xf32> to vector<8x128xf32>
      %199 = arith.subf %180, %198 : vector<8x128xf32>
      %cst_93 = arith.constant 9.99999996E-13 : f32
      %200 = vector.broadcast %cst_93 : f32 to vector<8x1xf32>
      %201 = arith.addf %197, %200 : vector<8x1xf32>
      %202 = math.rsqrt %201 : vector<8x1xf32>
      %203 = vector.broadcast %202 : vector<8x1xf32> to vector<8x128xf32>
      %204 = arith.mulf %199, %203 : vector<8x128xf32>
      %205 = vector.broadcast %185 : vector<1x128xf32> to vector<8x128xf32>
      %206 = arith.mulf %204, %205 : vector<8x128xf32>
      %207 = vector.broadcast %186 : vector<1x128xf32> to vector<8x128xf32>
      %208 = arith.addf %206, %207 : vector<8x128xf32>
      %209 = arith.truncf %208 : vector<8x128xf32> to vector<8x128xbf16>
      %c0_94 = arith.constant 0 : index
      %c0_95 = arith.constant 0 : index
      %210 = vector.load %arg17[%c0_94, %c0_95] : memref<128x128xbf16, #tpu.memory_space<vmem>>, vector<128x128xbf16>
      %cst_96 = arith.constant dense<0.000000e+00> : vector<8x128xf32>
      %211 = tpu.matmul %209, %210, %cst_96 {dimension_numbers = #tpu.dot_dimension_numbers<[1], [0], [0], [1], [0, 0, 1, 1], [], []>} : vector<8x128xbf16>, vector<128x128xbf16>, vector<8x128xf32> -> vector<8x128xf32>
      %c0_97 = arith.constant 0 : index
      %c0_98 = arith.constant 0 : index
      %212 = vector.load %arg18[%c0_97, %c0_98] : memref<1x128xf32, #tpu.memory_space<vmem>>, vector<1x128xf32>
      %213 = vector.broadcast %212 : vector<1x128xf32> to vector<8x128xf32>
      %214 = arith.addf %211, %213 : vector<8x128xf32>
      %c0_99 = arith.constant 0 : index
      %c0_100 = arith.constant 0 : index
      %215 = vector.load %arg19[%c0_99, %c0_100] : memref<8x128xf32, #tpu.memory_space<vmem>>, vector<8x128xf32>
      tpu.vector_store %arg19[%c0_99, %c0_100], %214 {strides = array<i32>} : memref<8x128xf32, #tpu.memory_space<vmem>>, vector<8x128xf32>,
    } else {
    }
    return
  }
  func.func @transform_0(%arg0: i32, %arg1: i32) -> (i32, i32) {
    %c0_i32 = arith.constant 0 : i32
    %c0_i32_0 = arith.constant 0 : i32
    return %arg0, %c0_i32 : i32, i32
  }
  func.func @transform_1(%arg0: i32, %arg1: i32) -> (i32, i32, i32) {
    %c0_i32 = arith.constant 0 : i32
    %c0_i32_0 = arith.constant 0 : i32
    %c0_i32_1 = arith.constant 0 : i32
    return %arg1, %c0_i32, %c0_i32_0 : i32, i32, i32
  }
  func.func @transform_2(%arg0: i32, %arg1: i32) -> (i32, i32, i32) {
    %c0_i32 = arith.constant 0 : i32
    %c0_i32_0 = arith.constant 0 : i32
    %c0_i32_1 = arith.constant 0 : i32
    return %arg1, %c0_i32, %c0_i32_0 : i32, i32, i32
  }
  func.func @transform_3(%arg0: i32, %arg1: i32) -> (i32, i32, i32) {
    %c0_i32 = arith.constant 0 : i32
    %c0_i32_0 = arith.constant 0 : i32
    %c0_i32_1 = arith.constant 0 : i32
    return %arg1, %c0_i32, %c0_i32_0 : i32, i32, i32
  }
  func.func @transform_4(%arg0: i32, %arg1: i32) -> (i32, i32, i32) {
    %c0_i32 = arith.constant 0 : i32
    %c0_i32_0 = arith.constant 0 : i32
    %c0_i32_1 = arith.constant 0 : i32
    return %arg1, %c0_i32, %c0_i32_0 : i32, i32, i32
  }
  func.func @transform_5(%arg0: i32, %arg1: i32) -> (i32, i32, i32) {
    %c0_i32 = arith.constant 0 : i32
    %c0_i32_0 = arith.constant 0 : i32
    %c0_i32_1 = arith.constant 0 : i32
    return %arg1, %c0_i32, %c0_i32_0 : i32, i32, i32
  }
  func.func @transform_6(%arg0: i32, %arg1: i32) -> (i32, i32, i32) {
    %c0_i32 = arith.constant 0 : i32
    %c0_i32_0 = arith.constant 0 : i32
    %c0_i32_1 = arith.constant 0 : i32
    return %arg1, %c0_i32, %c0_i32_0 : i32, i32, i32
  }
  func.func @transform_7(%arg0: i32, %arg1: i32) -> (i32, i32, i32) {
    %c0_i32 = arith.constant 0 : i32
    %c0_i32_0 = arith.constant 0 : i32
    %c0_i32_1 = arith.constant 0 : i32
    return %arg1, %c0_i32, %c0_i32_0 : i32, i32, i32
  }
  func.func @transform_8(%arg0: i32, %arg1: i32) -> (i32, i32, i32) {
    %c0_i32 = arith.constant 0 : i32
    %c0_i32_0 = arith.constant 0 : i32
    %c0_i32_1 = arith.constant 0 : i32
    return %arg1, %c0_i32, %c0_i32_0 : i32, i32, i32
  }
  func.func @transform_9(%arg0: i32, %arg1: i32) -> (i32, i32, i32) {
    %c0_i32 = arith.constant 0 : i32
    %c0_i32_0 = arith.constant 0 : i32
    %c0_i32_1 = arith.constant 0 : i32
    return %arg1, %c0_i32, %c0_i32_0 : i32, i32, i32
  }
  func.func @transform_10(%arg0: i32, %arg1: i32) -> (i32, i32, i32) {
    %c0_i32 = arith.constant 0 : i32
    %c0_i32_0 = arith.constant 0 : i32
    %c0_i32_1 = arith.constant 0 : i32
    return %arg1, %c0_i32, %c0_i32_0 : i32, i32, i32
  }
  func.func @transform_11(%arg0: i32, %arg1: i32) -> (i32, i32, i32) {
    %c0_i32 = arith.constant 0 : i32
    %c0_i32_0 = arith.constant 0 : i32
    %c0_i32_1 = arith.constant 0 : i32
    return %arg1, %c0_i32, %c0_i32_0 : i32, i32, i32
  }
  func.func @transform_12(%arg0: i32, %arg1: i32) -> (i32, i32, i32) {
    %c0_i32 = arith.constant 0 : i32
    %c0_i32_0 = arith.constant 0 : i32
    %c0_i32_1 = arith.constant 0 : i32
    return %arg1, %c0_i32, %c0_i32_0 : i32, i32, i32
  }
  func.func @transform_13(%arg0: i32, %arg1: i32) -> (i32, i32) {
    %c0_i32 = arith.constant 0 : i32
    %c0_i32_0 = arith.constant 0 : i32
    %c0_i32_1 = arith.constant 0 : i32
    return %c0_i32, %c0_i32_0 : i32, i32
  }
  func.func @transform_14(%arg0: i32, %arg1: i32) -> (i32, i32) {
    %c0_i32 = arith.constant 0 : i32
    %c0_i32_0 = arith.constant 0 : i32
    %c0_i32_1 = arith.constant 0 : i32
    return %c0_i32, %c0_i32_0 : i32, i32
  }
  func.func @transform_15(%arg0: i32, %arg1: i32) -> (i32, i32) {
    %c0_i32 = arith.constant 0 : i32
    %c0_i32_0 = arith.constant 0 : i32
    %c0_i32_1 = arith.constant 0 : i32
    return %c0_i32, %c0_i32_0 : i32, i32
  }
  func.func @transform_16(%arg0: i32, %arg1: i32) -> (i32, i32) {
    %c0_i32 = arith.constant 0 : i32
    %c0_i32_0 = arith.constant 0 : i32
    %c0_i32_1 = arith.constant 0 : i32
    return %c0_i32, %c0_i32_0 : i32, i32
  }
  func.func @transform_17(%arg0: i32, %arg1: i32) -> (i32, i32) {
    %c0_i32 = arith.constant 0 : i32
    %c0_i32_0 = arith.constant 0 : i32
    return %arg0, %c0_i32 : i32, i32
  }
}

</mosaic_0001>

<bundles_post_ra>
// kernel: vit_forward.1
= control target key start
LH: loop header
LB: loop body
LE: loop exit
PB: predicated region body
PF: predicated region fallthrough
CT: control target
= control target key end

     0   :  { %s4434_s0 = inlined_call_operand.hbm [shape: f32[16,128], index: 0, kind: input, shape index: {}]   ;;  %s4435_s1 = inlined_call_operand.hbm [shape: f32[2,1,128], index: 1, kind: input, shape index: {}]   ;;  %s4436_s2 = inlined_call_operand.hbm [shape: f32[2,1,128], index: 2, kind: input, shape index: {}]   ;;  %s4437_s3 = inlined_call_operand.hbm [shape: bf16[2,128,384], index: 3, kind: input, shape index: {}]   ;;  %s4438_s4 = inlined_call_operand.vmem [shape: f32[2,1,384], index: 4, kind: input, shape index: {}]   ;;  %s4439_s5 = inlined_call_operand.hbm [shape: bf16[2,128,128], index: 5, kind: input, shape index: {}]   ;;  %s4440_s6 = inlined_call_operand.vmem [shape: f32[2,1,128], index: 6, kind: input, shape index: {}]   ;;  %s4441_s7 = inlined_call_operand.vmem [shape: f32[2,1,128], index: 7, kind: input, shape index: {}]   ;;  %s4442_s8 = inlined_call_operand.vmem [shape: f32[2,1,128], index: 8, kind: input, shape index: {}]   ;;  %s4443_s9 = inlined_call_operand.hbm [shape: bf16[2,128,256], index: 9, kind: input, shape index: {}]   ;;  %s4444_s10 = inlined_call_operand.vmem [shape: f32[2,1,256], index: 10, kind: input, shape index: {}]   ;;  %s4445_s11 = inlined_call_operand.hbm [shape: bf16[2,256,128], index: 11, kind: input, shape index: {}]   ;;  %s4446_s12 = inlined_call_operand.vmem [shape: f32[2,1,128], index: 12, kind: input, shape index: {}]   ;;  %s4447_s13 = inlined_call_operand.vmem [shape: f32[1,128], index: 13, kind: input, shape index: {}]   ;;  %s4448_s14 = inlined_call_operand.vmem [shape: f32[1,128], index: 14, kind: input, shape index: {}]   ;;  %s4449_s15 = inlined_call_operand.hbm [shape: bf16[128,128], index: 15, kind: input, shape index: {}]   ;;  %s4450_s16 = inlined_call_operand.vmem [shape: f32[1,128], index: 16, kind: input, shape index: {}]   ;;  %s4451_s17 = inlined_call_operand.hbm [shape: f32[16,128], index: 17, kind: output, shape index: {}]  }
   0x1   :  { %4496 = sst [smem:[#allocation42_spill]] %s4434_s0 }
   0x2   :  { %4497 = sst [smem:[#allocation43_spill]] %s4435_s1 }
   0x3   :  { %4498 = sst [smem:[#allocation44_spill]] %s4436_s2 }
   0x4   :  { %4499 = sst [smem:[#allocation45_spill]] %s4437_s3 }
   0x5   :  { %4500 = sst [smem:[#allocation46_spill]] %s4438_s4 }
   0x6   :  { %4501 = sst [smem:[#allocation47_spill]] %s4439_s5 }
   0x7   :  { %4502 = sst [smem:[#allocation48_spill]] %s4440_s6 }
   0x8   :  { %4503 = sst [smem:[#allocation49_spill]] %s4441_s7 }
   0x9   :  { %4504 = sst [smem:[#allocation50_spill]] %s4442_s8 }
   0xa   :  { %4505 = sst [smem:[#allocation51_spill]] %s4443_s9 }
   0xb   :  { %4506 = sst [smem:[#allocation52_spill]] %s4444_s10 }
   0xc   :  { %4507 = sst [smem:[#allocation53_spill]] %s4445_s11 }
   0xd   :  { %4508 = sst [smem:[#allocation54_spill]] %s4446_s12 }
   0xe   :  { %4509 = sst [smem:[#allocation55_spill]] %s4447_s13 }
   0xf   :  { %4510 = sst [smem:[#allocation56_spill]] %s4448_s14 }
  0x10   :  { %4511 = sst [smem:[#allocation57_spill]] %s4449_s15 }
  0x11   :  { %4512 = sst [smem:[#allocation58_spill]] %s4450_s16 }
  0x12   :  { %4513 = sst [smem:[#allocation59_spill]] %s4451_s17 }
  0x13   :  { %22 = vsyncpa [#allocation5], 0 }
  0x14   :  { %24 = vsyncpa [#allocation5 + $0x1], 0 }
  0x15   :  { %25 = vsyncpa [#allocation8], 0 }
  0x16   :  { %27 = vsyncpa [#allocation8 + $0x1], 0 }
  0x17   :  { %28 = vsyncpa [#allocation11], 0 }
  0x18   :  { %30 = vsyncpa [#allocation11 + $0x1], 0 }
  0x19   :  { %31 = vsyncpa [#allocation14], 0 }
  0x1a   :  { %33 = vsyncpa [#allocation14 + $0x1], 0 }
  0x1b   :  { %34 = vsyncpa [#allocation17], 0 }
  0x1c   :  { %35 = vsyncpa [#allocation6], 0 }
  0x1d   :  { %37 = vsyncpa [#allocation6 + $0x1], 0  ;;  %s3646_s24 = smov 0   ;;  %s3648_s25 = smov 0  }
  0x1e   :  { %s3650_s26 = smov 0   ;;  %s3652_s27 = smov 0  }
  0x1f   :  { %s3654_s28 = smov 0   ;;  %s3656_s29 = smov 0  }
  0x20   :  { %s3658_s0 = smov 0   ;;  %s3660_s30 = smov 0  }
  0x21   :  { %s3662_s18 = smov 0   ;;  %s3664_s19 = smov 0  }
  0x22   :  { %s3666_s1 = smov 0  }
  0x23 LB: > { %4514 = sst [smem:[#allocation25_spill]] %s3495_s25  ;;  %p4458_p0 = scmp.eq.s32.totalorder %s3531_s1, 0  ;;  %s3531_s1 = sphi %s3666_s1, %s43_s1   ;;  %s3527_s19 = sphi %s3664_s19, %s4605_s19   ;;  %s3523_s18 = sphi %s3662_s18, %s4604_s18   ;;  %s3519_s30 = sphi %s3660_s30, %s4603_s30   ;;  %s3515_s0 = sphi %s3658_s0, %s4602_s0   ;;  %s3511_s29 = sphi %s3656_s29, %s4601_s29   ;;  %s3507_s28 = sphi %s3654_s28, %s4600_s28   ;;  %s3503_s27 = sphi %s3652_s27, %s4599_s27   ;;  %s3499_s26 = sphi %s3650_s26, %s4598_s26   ;;  %s3495_s25 = sphi %s3648_s25, %s4597_s25   ;;  %s3491_s24 = sphi %s3646_s24, %s4596_s24  }
  0x24   : > { %4515 = sst [smem:[#allocation26_spill]] %s3499_s26  ;;  %p95_p1 = scmp.ne.s32.totalorder %s3499_s26, %s3495_s25 }
  0x25   : > { %4516 = sst [smem:[#allocation27_spill]] %s3503_s27  ;;  %p4457_p2 = scmp.lt.s32.totalorder %s3531_s1, 4 }
  0x26   : > { %4517 = sst [smem:[#allocation28_spill]] %s3507_s28  ;;  %s3707_s21 = sand.u32 1, %s3531_s1  }
  0x27   : > { %4518 = sst [smem:[#allocation29_spill]] %s3511_s29  ;;  %p97_p3 = por %p95_p1, %p4458_p0 }
  0x28   : > { %4519 = sst [smem:[#allocation30_spill]] %s3515_s0  ;;  %s3712_s22 = sand.u32 1, %s3499_s26  }
  0x29   : > { %4520 = sst [smem:[#allocation31_spill]] %s3519_s30  ;;  %s2589_s23 = sshll.u32 %s3523_s18, 4 }
  0x2a   : > { %4521 = sst [smem:[#allocation32_spill]] %s3523_s18  ;;  %s4524_s16 = sld [smem:[#allocation43_spill]] }
  0x2b   : > { %4522 = sst [smem:[#allocation33_spill]] %s3527_s19  ;;  %s564_s20 = scalar_lea.vmem [#allocation7], %s3712_s22 }
  0x2c   : > { %4523 = sst [smem:[#allocation34_spill]] %s3531_s1  ;;  %s571_s13 = sshll.u32 %s564_s20, 4  ;;  %s3727_s13 = int_to_ptr.vmem [resolvable:$true] %s571_s13 }
  0x2d   : > { %p3723_p4 = pnand %p4457_p2, %p97_p3  ;;  %s4526_s2 = sld [smem:[#allocation44_spill]] }
  0x2e   : > { %s4461_s30 = scalar_lea.sflag [#allocation8], %s3707_s21 }
  0x2f   : > { %s4525_s12 = scalar_select %p3723_p4, 1, 0 }
  0x30   : > { %s3718_s14 = scalar_lea.hbm %s4524_s16, %s2589_s23  ;;  %p3739_p6 = pneg %p3723_p4 }
  0x31   : > { %s3155_s8 = scalar_lea.hbm %s3718_s14, 16  ;;  %s3160_s0 = scalar_lea.hbm %s4524_s16, 32 }
  0x32   : > { %p3156_p5 = scmp.ne.s32.totalorder %s3718_s14, %s3155_s8  ;;  %p3161_p9 = scmp.lt.u32.totalorder %s3718_s14, %s4524_s16 }
  0x33   : > { %s3732_s17 = scalar_lea.hbm %s4526_s2, %s2589_s23  ;;  %p3162_p10 = scmp.lt.u32.totalorder %s3160_s0, %s3155_s8 }
  0x34   : > { %s4527_s7 = scalar_select %p3739_p6, 1, 0 }
  0x35   : > { %p3158_p7 = pnand %p3739_p6, %p3156_p5  ;;  %p3163_p11 = por %p3162_p10, %p3161_p9 }
  0x36   : > { %p3164_p12 = scmp.lt.u32.totalorder %s3155_s8, %s3718_s14 }
  0x37   : > { %p3159_p8 = pneg %p3158_p7 }
  0x38   : > { %p3165_p13 = por %p3164_p12, %p3163_p11 }
  0x3a   : > { %p3166_p1 = pnand %p3165_p13, %p3159_p8 }
  0x3c   : > { %3169 = shalt.err (!%p3166_p1)
}
  0x3d   : > { %s3170_s10 = scalar_lea.vmem %s3727_s13, 16  ;;  %s3533_s6 = smov [#allocation7]  }
  0x3e   : > { %p3171_p3 = scmp.ne.s32.totalorder %s3727_s13, %s3170_s10  ;;  %s3175_s23 = sshll.u32 %s3533_s6, 4  ;;  %s3176_s23 = int_to_ptr.vmem [resolvable:$false] %s3175_s23 }
  0x3f   : > { %s3177_s5 = scalar_lea.vmem %s3176_s23, 32  ;;  %p3178_p2 = scmp.lt.s32.totalorder %s3727_s13, %s3176_s23 }
  0x40   : > { %p3173_p5 = pnand %p3171_p3, %p3739_p6  ;;  %p3179_p0 = scmp.lt.s32.totalorder %s3177_s5, %s3170_s10 }
  0x42   : > { %p3174_p7 = pneg %p3173_p5  ;;  %p3180_p9 = por %p3179_p0, %p3178_p2 }
  0x44   : > { %p3181_p10 = pnand %p3180_p9, %p3174_p7 }
  0x46   : > { %3184 = shalt.err (!%p3181_p10)
}
  0x47   : > { %2914 = dma.hbm_to_vmem [thread:$0]  (!%p3723_p4), %s3718_s14, 16, %s3727_s13, %s4461_s30  }
  0x48   : > { %s2880_s8 = smul.u32 192, %s3712_s22  ;;  %s4528_s3 = sld [smem:[#allocation45_spill]] }
  0x49   : > { %s2881_s0 = smul.u32 3072, %s3523_s18  ;;  %s2595_s5 = sshll.u32 %s3712_s22, 7 }
  0x4a   : > { %s599_s6 = scalar_lea.vmem [#allocation10], %s2880_s8  ;;  %s4463_s16 = scalar_lea.sflag [#allocation11], %s3707_s21 }
  0x4b   : > { %s606_s23 = sshll.u32 %s599_s6, 4  ;;  %s3771_s23 = int_to_ptr.vmem [resolvable:$true] %s606_s23 }
  0x4e   : > { %s3769_s10 = scalar_lea.hbm %s4528_s3, %s2881_s0  ;;  %s3190_s0 = scalar_lea.hbm %s4528_s3, 6144 }
  0x4f   : > { %s3185_s2 = scalar_lea.hbm %s3769_s10, 3072  ;;  %p3191_p11 = scmp.lt.u32.totalorder %s3769_s10, %s4528_s3 }
  0x50   : > { %p3186_p0 = scmp.ne.s32.totalorder %s3769_s10, %s3185_s2  ;;  %p3192_p12 = scmp.lt.u32.totalorder %s3190_s0, %s3185_s2 }
  0x51   : > { %p3194_p1 = scmp.lt.u32.totalorder %s3185_s2, %s3769_s10 }
  0x52   : > { %p3188_p2 = pnand %p3186_p0, %p3739_p6  ;;  %p3193_p13 = por %p3192_p12, %p3191_p11 }
  0x54   : > { %p3189_p8 = pneg %p3188_p2  ;;  %p3195_p3 = por %p3194_p1, %p3193_p13 }
  0x56   : > { %p3196_p5 = pnand %p3195_p3, %p3189_p8 }
  0x58   : > { %3199 = shalt.err (!%p3196_p5)
}
  0x59   : > { %s3200_s8 = scalar_lea.vmem %s3771_s23, 3072  ;;  %s3534_s6 = smov [#allocation10]  }
  0x5a   : > { %p3201_p7 = scmp.ne.s32.totalorder %s3771_s23, %s3200_s8  ;;  %s3205_s13 = sshll.u32 %s3534_s6, 4  ;;  %s3206_s13 = int_to_ptr.vmem [resolvable:$false] %s3205_s13 }
  0x5b   : > { %s3207_s14 = scalar_lea.vmem %s3206_s13, 6144  ;;  %p3208_p0 = scmp.lt.s32.totalorder %s3771_s23, %s3206_s13 }
  0x5c   : > { %p3203_p9 = pnand %p3201_p7, %p3739_p6  ;;  %p3209_p2 = scmp.lt.s32.totalorder %s3207_s14, %s3200_s8 }
  0x5e   : > { %p3204_p10 = pneg %p3203_p9  ;;  %p3210_p11 = por %p3209_p2, %p3208_p0 }
  0x60   : > { %p3211_p12 = pnand %p3210_p11, %p3204_p10 }
  0x62   : > { %3214 = shalt.err (!%p3211_p12)
}
  0x63   : > { %s3535_s2 = smov 192   ;;  %s3536_s0 = smov 12  }
  0x64   : > { %2920 = dma.hbm_to_vmem [thread:$0]  (!%p3723_p4), %s3769_s10, 3072, %s3771_s23, %s4463_s16, %s3535_s2, %s3535_s2, %s3536_s0  }
  0x65   : > { %s2705_s20 = sshll.u32 %s3523_s18, 11  ;;  %s4529_s9 = sld [smem:[#allocation51_spill]] }
  0x66   : > { %s666_s13 = scalar_lea.vmem [#allocation13], %s2595_s5  ;;  %s4462_s30 = scalar_lea.sflag [#allocation14], %s3707_s21 }
  0x67   : > { %s673_s14 = sshll.u32 %s666_s13, 4  ;;  %s3808_s14 = int_to_ptr.vmem [resolvable:$true] %s673_s14 }
  0x6b   : > { %s3804_s6 = scalar_lea.hbm %s4529_s9, %s2705_s20  ;;  %s3220_s2 = scalar_lea.hbm %s4529_s9, 4096 }
  0x6c   : > { %s3215_s3 = scalar_lea.hbm %s3804_s6, 2048  ;;  %p3221_p3 = scmp.lt.u32.totalorder %s3804_s6, %s4529_s9 }
  0x6d   : > { %p3216_p8 = scmp.ne.s32.totalorder %s3804_s6, %s3215_s3  ;;  %p3222_p5 = scmp.lt.u32.totalorder %s3220_s2, %s3215_s3 }
  0x6e   : > { %p3224_p9 = scmp.lt.u32.totalorder %s3215_s3, %s3804_s6 }
  0x6f   : > { %p3218_p13 = pnand %p3216_p8, %p3739_p6  ;;  %p3223_p7 = por %p3222_p5, %p3221_p3 }
  0x71   : > { %p3219_p1 = pneg %p3218_p13  ;;  %p3225_p10 = por %p3224_p9, %p3223_p7 }
  0x73   : > { %p3226_p0 = pnand %p3225_p10, %p3219_p1 }
  0x75   : > { %3229 = shalt.err (!%p3226_p0)
}
  0x76   : > { %s3230_s8 = scalar_lea.vmem %s3808_s14, 2048  ;;  %s3537_s13 = smov [#allocation13]  }
  0x77   : > { %p3231_p2 = scmp.ne.s32.totalorder %s3808_s14, %s3230_s8  ;;  %s3235_s10 = sshll.u32 %s3537_s13, 4  ;;  %s3236_s10 = int_to_ptr.vmem [resolvable:$false] %s3235_s10 }
  0x78   : > { %s3237_s23 = scalar_lea.vmem %s3236_s10, 4096  ;;  %p3238_p8 = scmp.lt.s32.totalorder %s3808_s14, %s3236_s10 }
  0x79   : > { %p3233_p11 = pnand %p3231_p2, %p3739_p6  ;;  %p3239_p13 = scmp.lt.s32.totalorder %s3237_s23, %s3230_s8 }
  0x7b   : > { %p3234_p12 = pneg %p3233_p11  ;;  %p3240_p3 = por %p3239_p13, %p3238_p8 }
  0x7d   : > { %p3241_p5 = pnand %p3240_p3, %p3234_p12 }
  0x7f   : > { %3244 = shalt.err (!%p3241_p5)
}
  0x80   : > { %s3538_s3 = smov 128   ;;  %s3539_s2 = smov 8  }
  0x81   : > { %2926 = dma.hbm_to_vmem [thread:$0]  (!%p3723_p4), %s3804_s6, 2048, %s3808_s14, %s4462_s30, %s3538_s3, %s3538_s3, %s3539_s2  }
  0x82   : > { %s4530_s11 = sld [smem:[#allocation53_spill]]  ;;  %s694_s13 = scalar_lea.vmem [#allocation15], %s2595_s5 }
  0x83   : > { %s701_s10 = sshll.u32 %s694_s13, 4  ;;  %s3846_s23 = sadd.s32 4294967295, %s3531_s1   ;;  %s3843_s10 = int_to_ptr.vmem [resolvable:$true] %s701_s10 }
  0x84   : > { %p4464_p1 = scmp.eq.s32.totalorder %s3846_s23, 0  ;;  %p101_p7 = scmp.ne.s32.totalorder %s3495_s25, %s3491_s24 }
  0x85   : > { %p2584_p9 = scmp.ge.s32.totalorder %s3531_s1, 1  ;;  %p508_p10 = scmp.lt.s32.totalorder %s3531_s1, 5 }
  0x86   : > { %p3855_p0 = por %p101_p7, %p4464_p1  ;;  %s3540_s5 = smov [#allocation16]  }
  0x87   : > { %p3859_p2 = pnand %p2584_p9, %p508_p10  ;;  %s526_s14 = sshll.u32 %s3540_s5, 4  ;;  %s527_s14 = int_to_ptr.vmem [resolvable:$true] %s526_s14 }
  0x88   : > { %s3839_s8 = scalar_lea.hbm %s4530_s11, %s2705_s20  ;;  %s4535_s15 = sld [smem:[#allocation57_spill]] }
  0x89   : > { %s4531_s6 = scalar_select %p3855_p0, 1, 0 }
  0x8a   : > { %s4533_s20 = scalar_select %p3859_p2, 1, 0 }
  0x8b   : > { %4532 = sst [smem:[#allocation35_spill]] %s4531_s6  ;;  %p2904_p11 = pneg %p3859_p2 }
  0x8d   : > { %p3867_p12 = pnand %p2904_p11, %p4464_p1 }
  0x8e   : > { %s3245_s0 = scalar_lea.hbm %s4535_s15, 1024 }
  0x8f   : > { %p3246_p8 = scmp.ne.s32.totalorder %s4535_s15, %s3245_s0  ;;  %p3247_p13 = pneg %p3867_p12 }
  0x90   : > { %p3252_p7 = scmp.lt.u32.totalorder %s3245_s0, %s4535_s15 }
  0x91   : > { %p3248_p3 = pnand %p3247_p13, %p3246_p8 }
  0x93   : > { %p3249_p5 = pneg %p3248_p3 }
  0x95   : > { %p3254_p9 = pnand %p3252_p7, %p3249_p5 }
  0x97   : > { %3257 = shalt.err (!%p3254_p9)
}
  0x98   : > { %s3258_s16 = scalar_lea.vmem %s527_s14, 1024  ;;  %p3266_p0 = scmp.lt.s32.totalorder %s527_s14, %s527_s14 }
  0x99   : > { %p3259_p10 = scmp.ne.s32.totalorder %s527_s14, %s3258_s16  ;;  %p3267_p2 = scmp.lt.s32.totalorder %s3258_s16, %s3258_s16 }
  0x9b   : > { %p3261_p11 = pnand %p3259_p10, %p3247_p13  ;;  %p3268_p4 = por %p3267_p2, %p3266_p0 }
  0x9d   : > { %p3262_p1 = pneg %p3261_p11 }
  0x9f   : > { %p3269_p6 = pnand %p3268_p4, %p3262_p1 }
  0xa1   : > { %3272 = shalt.err (!%p3269_p6)
}
  0xa2   : > { %s4471_s3 = smov 64   ;;  %s4473_s16 = smov 4  }
  0xa3   : > { %2907 = dma.hbm_to_vmem [thread:$0]  (!%p3867_p12), %s4535_s15, 1024, %s527_s14, [#allocation17], %s4471_s3, %s4471_s3, %s4473_s16  }
  0xa4   : > { %s2583_s0 = sadd.s32 4294967294, %s3531_s1   ;;  %s52_s4 = sadd.s32 1, %s3523_s18 }
  0xa5   : > { %s55_s13 = sadd.s32 1, %s3527_s19  ;;  %p53_p4 = scmp.ge.s32.totalorder %s52_s4, 2 }
  0xa6   : > { %s62_s5 = sadd.s32 1, %s3511_s29  ;;  %p69_p6 = scmp.ne.s32.totalorder %s3511_s29, %s3507_s28 }
  0xa7   : > { %p75_p1 = scmp.ne.s32.totalorder %s3507_s28, %s3503_s27  ;;  %s4607_s4 = smov (%p53_p4, %s52_s4), 0 }
  0xa8   : > { %4536 = sst [smem:[#allocation36_spill]] %s4607_s4  ;;  %s4609_s13 = smov (!%p53_p4, %s55_s13), %s3527_s19 }
  0xa9   : > { %p4537_p0 = scmp.eq.s32.totalorder %s3531_s1, 0  ;;  %p4539_p12 = scmp.eq.s32.totalorder %s3846_s23, 0 }
  0xaa   : > { %p57_p13 = scmp.ge.s32.totalorder %s4609_s13, 2  ;;  %s85_s30 = ssub.s32 %s3523_s18, %s4607_s4 }
  0xab   : > { %p3906_p2 = por %p4537_p0, %p69_p6  ;;  %p3915_p8 = por %p4539_p12, %p75_p1 }
  0xac   : > { %p86_p3 = scmp.eq.s32.totalorder %s85_s30, 0  ;;  %p495_p5 = scmp.eq.s32.totalorder %s3846_s23, 3 }
  0xad   : > { %s4540_s24 = scalar_select %p3915_p8, 1, 0 }
  0xae   : > { %s4611_s13 = smov (%p57_p13, %s4609_s13), 0  ;;  %s4542_s2 = sadd.s32 1, %s3499_s26 }
  0xaf   : > { %4541 = sst [smem:[#allocation37_spill]] %s4611_s13  ;;  %s59_s16 = ssub.s32 %s3527_s19, %s4611_s13 }
  0xb0   : > { %s3927_s3 = scalar_select %p86_p3, %s3499_s26, %s4542_s2  }
  0xb1   : > { %p3934_p7 = por %p495_p5, %p69_p6  ;;  %p60_p9 = scmp.eq.s32.totalorder %s59_s16, 0 }
  0xb2   : > { %4543 = sst [smem:[#allocation38_spill]] %s3927_s3  ;;  %p501_p10 = scmp.eq.s32.totalorder %s2583_s0, 3 }
  0xb3   : > { %s4544_s9 = scalar_select %p3934_p7, 1, 0 }
  0xb4   : > { %s543_s15 = sand.u32 1, %s3511_s29   ;;  %s2588_s6 = sshll.u32 %s3527_s19, 7 }
  0xb5   : > { %4545 = sst [smem:[#allocation39_spill]] %s4544_s9  ;;  %p3946_p11 = por %p501_p10, %p75_p1 }
  0xb6   : > { %s3941_s25 = scalar_select %p60_p9, %s3511_s29, %s62_s5  }
  0xb7   : > { %s4547_s30 = scalar_select %p3946_p11, 1, 0 }
  0xb8   : > { %4546 = sst [smem:[#allocation40_spill]] %s3941_s25  ;;  %s2587_s4 = sshll.u32 %s543_s15, 3 }
  0xb9   : > { %4548 = sst [smem:[#allocation41_spill]] %s4547_s30  ;;  %s4549_s13 = sld [smem:[#allocation42_spill]] }
  0xba   : > { %p4550_p4 = scmp.lt.s32.totalorder %s3531_s1, 4  ;;  %s547_s0 = scalar_lea.vmem [#allocation4], %s2587_s4 }
  0xbb   : > { %s554_s5 = sshll.u32 %s547_s0, 4  ;;  %s544_s19 = scalar_lea.sflag [#allocation5], %s543_s15  ;;  %s3963_s5 = int_to_ptr.vmem [resolvable:$true] %s554_s5 }
  0xbc   : > { %p3959_p6 = pnand %p4550_p4, %p3906_p2 }
  0xbe   : > { %p3275_p0 = pneg %p3959_p6 }
  0xbf   : > { %s3953_s26 = scalar_lea.hbm %s4549_s13, %s2588_s6  ;;  %s3278_s2 = scalar_lea.hbm %s4549_s13, 256 }
  0xc0   : > { %s3273_s3 = scalar_lea.hbm %s3953_s26, 128  ;;  %p3279_p2 = scmp.lt.u32.totalorder %s3953_s26, %s4549_s13 }
  0xc1   : > { %p3274_p1 = scmp.ne.s32.totalorder %s3953_s26, %s3273_s3  ;;  %p3280_p3 = scmp.lt.u32.totalorder %s3278_s2, %s3273_s3 }
  0xc2   : > { %p3282_p9 = scmp.lt.u32.totalorder %s3273_s3, %s3953_s26 }
  0xc3   : > { %p3276_p12 = pnand %p3275_p0, %p3274_p1  ;;  %p3281_p5 = por %p3280_p3, %p3279_p2 }
  0xc5   : > { %p3277_p13 = pneg %p3276_p12  ;;  %p3283_p10 = por %p3282_p9, %p3281_p5 }
  0xc7   : > { %p3284_p4 = pnand %p3283_p10, %p3277_p13 }
  0xc9   : > { %3287 = shalt.err (!%p3284_p4)
}
  0xca   : > { %s3288_s15 = scalar_lea.vmem %s3963_s5, 128  ;;  %s3543_s4 = smov [#allocation4]  }
  0xcb   : > { %p3289_p1 = scmp.ne.s32.totalorder %s3963_s5, %s3288_s15  ;;  %s3293_s0 = sshll.u32 %s3543_s4, 4  ;;  %s3294_s0 = int_to_ptr.vmem [resolvable:$false] %s3293_s0 }
  0xcc   : > { %s3295_s25 = scalar_lea.vmem %s3294_s0, 256  ;;  %p3296_p7 = scmp.lt.s32.totalorder %s3963_s5, %s3294_s0 }
  0xcd   : > { %p3291_p12 = pnand %p3289_p1, %p3275_p0  ;;  %p3297_p2 = scmp.lt.s32.totalorder %s3295_s25, %s3288_s15 }
  0xcf   : > { %p3292_p11 = pneg %p3291_p12  ;;  %p3298_p3 = por %p3297_p2, %p3296_p7 }
  0xd1   : > { %p3299_p5 = pnand %p3298_p3, %p3292_p11 }
  0xd3   : > { %3302 = shalt.err (!%p3299_p5)
}
  0xd4   : > { %2911 = dma.hbm_to_vmem [thread:$0]  (!%p3959_p6), %s3953_s26, 128, %s3963_s5, %s544_s19  }
  0xd5   : > { %s581_s29 = scalar_lea.vmem [#allocation9], %s3712_s22  ;;  %s2592_s6 = sshll.u32 %s3712_s22, 6 }
  0xd6   : > { %s588_s3 = sshll.u32 %s581_s29, 4  ;;  %s3303_s14 = scalar_lea.hbm %s3732_s17, 16  ;;  %s589_s3 = int_to_ptr.vmem [resolvable:$true] %s588_s3 }
  0xd7   : > { %p3304_p7 = scmp.ne.s32.totalorder %s3732_s17, %s3303_s14  ;;  %p4552_p11 = scmp.ne.s32.totalorder %s4527_s7, 0 }
  0xd8   : > { %s4553_s15 = sld [smem:[#allocation44_spill]]  ;;  %p3312_p6 = scmp.lt.u32.totalorder %s3303_s14, %s3732_s17 }
  0xd9   : > { %p3306_p0 = pnand %p3304_p7, %p4552_p11 }
  0xdb   : > { %p3307_p13 = pneg %p3306_p0 }
  0xde   : > { %s3308_s4 = scalar_lea.hbm %s4553_s15, 32  ;;  %p3309_p9 = scmp.lt.u32.totalorder %s3732_s17, %s4553_s15 }
  0xdf   : > { %p3310_p10 = scmp.lt.u32.totalorder %s3308_s4, %s3303_s14 }
  0xe1   : > { %p3311_p4 = por %p3310_p10, %p3309_p9 }
  0xe3   : > { %p3313_p1 = por %p3312_p6, %p3311_p4 }
  0xe5   : > { %p3314_p12 = pnand %p3313_p1, %p3307_p13 }
  0xe7   : > { %3317 = shalt.err (!%p3314_p12)
}
  0xe8   : > { %s3318_s26 = scalar_lea.vmem %s589_s3, 16  ;;  %s3544_s19 = smov [#allocation9]  }
  0xe9   : > { %p3319_p2 = scmp.ne.s32.totalorder %s589_s3, %s3318_s26  ;;  %s3323_s5 = sshll.u32 %s3544_s19, 4  ;;  %s3324_s5 = int_to_ptr.vmem [resolvable:$false] %s3323_s5 }
  0xea   : > { %s3325_s29 = scalar_lea.vmem %s3324_s5, 32  ;;  %p3326_p7 = scmp.lt.s32.totalorder %s589_s3, %s3324_s5 }
  0xeb   : > { %p3321_p3 = pnand %p3319_p2, %p4552_p11  ;;  %p3327_p0 = scmp.lt.s32.totalorder %s3325_s29, %s3318_s26 }
  0xed   : > { %p3322_p5 = pneg %p3321_p3  ;;  %p3328_p8 = por %p3327_p0, %p3326_p7 }
  0xef   : > { %p3329_p9 = pnand %p3328_p8, %p3322_p5 }
  0xf1   : > { %3332 = shalt.err (!%p3329_p9)
}
  0xf2   : > { %p4554_p10 = scmp.ne.s32.totalorder %s4525_s12, 0  ;;  %s4555_s14 = scalar_lea.sflag [#allocation8], %s3707_s21 }
  0xf3   : > { %s2704_s16 = sshll.u32 %s3523_s18, 10  ;;  %s627_s2 = scalar_lea.vmem [#allocation12], %s2592_s6 }
  0xf4   : > { %2917 = dma.hbm_to_vmem [thread:$0]  (!%p4554_p10), %s3732_s17, 16, %s589_s3, %s4555_s14  }
  0xf5   : > { %s634_s15 = sshll.u32 %s627_s2, 4  ;;  %s4556_s25 = sld [smem:[#allocation47_spill]]  ;;  %s4019_s15 = int_to_ptr.vmem [resolvable:$true] %s634_s15 }
  0xfb   : > { %s4557_s5 = smov %s4556_s25  ;;  %s4017_s26 = scalar_lea.hbm %s4556_s25, %s2704_s16 }
  0xfc   : > { %s3333_s19 = scalar_lea.hbm %s4017_s26, 1024  ;;  %s3338_s3 = scalar_lea.hbm %s4557_s5, 2048 }
  0xfd   : > { %p3334_p8 = scmp.ne.s32.totalorder %s4017_s26, %s3333_s19  ;;  %p3339_p6 = scmp.lt.u32.totalorder %s4017_s26, %s4557_s5 }
  0xfe   : > { %p3340_p1 = scmp.lt.u32.totalorder %s3338_s3, %s3333_s19  ;;  %p3342_p2 = scmp.lt.u32.totalorder %s3333_s19, %s4017_s26 }
  0xff   : > { %p3336_p13 = pnand %p3334_p8, %p4552_p11 }
 0x100   : > { %p3341_p12 = por %p3340_p1, %p3339_p6 }
 0x101   : > { %p3337_p4 = pneg %p3336_p13 }
 0x102   : > { %p3343_p3 = por %p3342_p2, %p3341_p12 }
 0x104   : > { %p3344_p5 = pnand %p3343_p3, %p3337_p4 }
 0x106   : > { %3347 = shalt.err (!%p3344_p5)
}
 0x107   : > { %s3348_s14 = scalar_lea.vmem %s4019_s15, 1024  ;;  %s3545_s16 = smov [#allocation12]  }
 0x108   : > { %p3349_p7 = scmp.ne.s32.totalorder %s4019_s15, %s3348_s14  ;;  %s3353_s2 = sshll.u32 %s3545_s16, 4  ;;  %s3354_s2 = int_to_ptr.vmem [resolvable:$false] %s3353_s2 }
 0x109   : > { %s3355_s4 = scalar_lea.vmem %s3354_s2, 2048  ;;  %p3356_p8 = scmp.lt.s32.totalorder %s4019_s15, %s3354_s2 }
 0x10a   : > { %p3351_p0 = pnand %p3349_p7, %p4552_p11  ;;  %p3357_p13 = scmp.lt.s32.totalorder %s3355_s4, %s3348_s14 }
 0x10c   : > { %p3352_p9 = pneg %p3351_p0  ;;  %p3358_p6 = por %p3357_p13, %p3356_p8 }
 0x10e   : > { %p3359_p1 = pnand %p3358_p6, %p3352_p9 }
 0x110   : > { %3362 = shalt.err (!%p3359_p1)
}
 0x111   : > { %s4558_s0 = smov 4   ;;  %s4559_s25 = smov 64  }
 0x112   : > { %s4560_s19 = scalar_lea.sflag [#allocation11], %s3707_s21  ;;  %s3363_s17 = scalar_lea.hbm %s3839_s8, 2048 }
 0x113   : > { %2923 = dma.hbm_to_vmem [thread:$0]  (!%p4554_p10), %s4017_s26, 1024, %s4019_s15, %s4560_s19, %s4559_s25, %s4559_s25, %s4558_s0  }
 0x114   : > { %p3364_p4 = scmp.ne.s32.totalorder %s3839_s8, %s3363_s17  ;;  %s3368_s6 = scalar_lea.hbm %s4530_s11, 4096 }
 0x115   : > { %p3369_p3 = scmp.lt.u32.totalorder %s3839_s8, %s4530_s11  ;;  %p3370_p5 = scmp.lt.u32.totalorder %s3368_s6, %s3363_s17 }
 0x116   : > { %p3366_p12 = pnand %p3364_p4, %p4552_p11  ;;  %p3372_p0 = scmp.lt.u32.totalorder %s3363_s17, %s3839_s8 }
 0x117   : > { %p3371_p7 = por %p3370_p5, %p3369_p3 }
 0x118   : > { %p3367_p2 = pneg %p3366_p12 }
 0x119   : > { %p3373_p9 = por %p3372_p0, %p3371_p7 }
 0x11b   : > { %p3374_p8 = pnand %p3373_p9, %p3367_p2 }
 0x11d   : > { %3377 = shalt.err (!%p3374_p8)
}
 0x11e   : > { %s3378_s15 = scalar_lea.vmem %s3843_s10, 2048  ;;  %s3546_s26 = smov [#allocation15]  }
 0x11f   : > { %p3379_p13 = scmp.ne.s32.totalorder %s3843_s10, %s3378_s15  ;;  %s3383_s16 = sshll.u32 %s3546_s26, 4  ;;  %s3384_s16 = int_to_ptr.vmem [resolvable:$false] %s3383_s16 }
 0x120   : > { %s3385_s2 = scalar_lea.vmem %s3384_s16, 4096  ;;  %p3386_p4 = scmp.lt.s32.totalorder %s3843_s10, %s3384_s16 }
 0x121   : > { %p3381_p6 = pnand %p3379_p13, %p4552_p11  ;;  %p3387_p12 = scmp.lt.s32.totalorder %s3385_s2, %s3378_s15 }
 0x123   : > { %p3382_p1 = pneg %p3381_p6  ;;  %p3388_p3 = por %p3387_p12, %p3386_p4 }
 0x125   : > { %p3389_p5 = pnand %p3388_p3, %p3382_p1 }
 0x127   : > { %3392 = shalt.err (!%p3389_p5)
}
 0x128   : > { %s4561_s4 = scalar_lea.sflag [#allocation14], %s3707_s21  ;;  %p4562_p11 = scmp.ne.s32.totalorder %s4533_s20, 0 }
 0x129   : > { %2929 = dma.hbm_to_vmem [thread:$0]  (!%p4554_p10), %s3839_s8, 2048, %s3843_s10, %s4561_s4, %s4559_s25, %s4559_s25, %s4558_s0  }
 0x12a   : > { %719 = sbr.rel (%p4562_p11) target bundleno = 3853 (0xf0d), region = 88  ;;  %s4076_s7 = sand.u32 (!%p4562_p11), 1, %s3507_s28  }
 0x12b   : > { %s4485_s19 = sshll.u32 (!%p4562_p11), %s4076_s7, 3  ;;  %s722_s12 = scalar_lea.sflag (!%p4562_p11), [#allocation5], %s4076_s7 }
 0x12c   : > { %s4082_s17 = scalar_lea.vmem (!%p4562_p11), [#allocation4], %s4485_s19  ;;  %p4563_p2 = scmp.ne.s32.totalorder (!%p4562_p11), %s4540_s24, 0 }
 0x131   : > { %3466 = dma.done.wait (%p4563_p2), %s722_s12, 128  }
 0x132   : > { %3468 = vsyncadd (%p4563_p2), %s722_s12, 4294967168  ;;  %s4564_s21 = sld [smem:[#allocation25_spill]]  ;;  %s4565_s8 = sld [smem:[#allocation35_spill]] }
 0x133   : > { %s730_s10 = sand.u32 1, %s3846_s23  }
 0x134   : > { %s731_s0 = scalar_lea.sflag [#allocation8], %s730_s10 }
 0x138   : > { %s4090_s20 = sand.u32 1, %s4564_s21   ;;  %p4566_p10 = scmp.ne.s32.totalorder %s4565_s8, 0 }
 0x13a   : > { %3470 = dma.done.wait (%p4566_p10), %s731_s0, 32  }
 0x13b   : > { %3472 = vsyncadd (%p4566_p10), %s731_s0, 4294967264  ;;  %s2882_s22 = smul.u32 192, %s4090_s20  ;;  %s747_s3 = scalar_lea.sflag [#allocation11], %s730_s10 }
 0x13d   : > { %s4099_s6 = scalar_lea.vmem [#allocation10], %s2882_s22 }
 0x13e   : > { %3474 = dma.done.wait (%p4566_p10), %s747_s3, 4096  }
 0x13f   : > { %3476 = vsyncadd (%p4566_p10), %s747_s3, 4294963200  ;;  %s2603_s29 = sshll.u32 %s4090_s20, 6  ;;  %s2604_s14 = sshll.u32 %s4090_s20, 7 }
 0x140   : > { %s4107_s15 = scalar_lea.vmem [#allocation12], %s2603_s29  ;;  %s765_s26 = scalar_lea.sflag [#allocation14], %s730_s10 }
 0x141   : > { %s4109_s16 = scalar_lea.vmem [#allocation13], %s2604_s14 }
 0x142   : > { %3478 = dma.done.wait (%p4566_p10), %s765_s26, 4096  }
 0x143   : > { %3480 = vsyncadd (%p4566_p10), %s765_s26, 4294963200  ;;  %s4115_s2 = scalar_lea.vmem [#allocation15], %s2604_s14  ;;  %p4567_p7 = scmp.eq.s32.totalorder %s3846_s23, 0 }
 0x145   : > { %3482 = dma.done.wait (%p4567_p7), [#allocation17], 1024   ;;  %p4568_p0 = pmov %p4567_p7 }
 0x146   : > { %s4569_s4 = sld [smem:[#allocation30_spill]]  ;;  %s4570_s0 = sld [smem:[#allocation48_spill]] }
 0x147   : > { %3484 = vsyncadd (%p4568_p0), [#allocation17], 4294966272  ;;  %s4571_s29 = sld [smem:[#allocation49_spill]]  ;;  %s4572_s25 = sld [smem:[#allocation50_spill]] }
 0x148   : > { %s4573_s13 = sld [smem:[#allocation46_spill]]  ;;  %s4574_s1 = sld [smem:[#allocation52_spill]] }
 0x149   : > { %s4576_s23 = sshll.u32 %s4076_s7, 3 }
 0x14c   : > { %p880_p9 = scmp.lt.s32.totalorder %s4569_s4, 1  ;;  %p2609_p8 = scmp.ne.s32.totalorder %s4569_s4, 0 }
 0x14d   : > { %v905_v0 = vld [vmem:[%s4082_s17] sm:$0xff] (!%p2609_p8) }
 0x14e   : > { %s4123_s12 = scalar_select %p880_p9, %s4569_s4, 1 }
 0x14f   : > { %906 = vst [vmem:[#allocation2] sm:$0xff] (!%p2609_p8), %v905_v0 }
 0x150   : > { %s2883_s21 = smul.u32 3, %s4123_s12  ;;  %s886_s22 = scalar_lea.vmem %s4570_s0, %s4123_s12 }
 0x151   : > { %s889_s14 = scalar_lea.vmem %s4571_s29, %s4123_s12  ;;  %s892_s19 = scalar_lea.vmem %s4572_s25, %s4123_s12 }
 0x152   : > { %s4141_s18 = scalar_lea.vmem %s4573_s13, %s2883_s21  ;;  %s2608_s28 = sshll.u32 %s4123_s12, 1 }
 0x153   : > { %s4147_s9 = scalar_lea.vmem %s4574_s1, %s2608_s28  ;;  %s4575_s0 = sld [smem:[#allocation54_spill]] }
 0x154   : > { %s4155_s29 = scalar_lea.vmem [#allocation18], %s4576_s23  ;;  %904 = sbr.rel (%p2609_p8) target bundleno = 347 (0x15b), region = 124 }
 0x159   : > { %s899_s3 = scalar_lea.vmem %s4575_s0, %s4123_s12 }
 0x15b PF: > { %v4159_v1 = vld [vmem:[#allocation2] sm:$0xff]  ;;  %v3041_v2 = vld [vmem:[%s4099_s6 + $0x4] ss:$12 sps:$4 sm:$0xff]   ;;  %v3547_v4 = vmov 0.0   ;;  %v3044_v5 = vld [vmem:[%s4099_s6 + $0x8] ss:$12 sps:$4 sm:$0xff]   ;;  %v971_v42 = vlaneseq }
 0x15c   : > { %910 = vadd.xlane.f32.xlu0 %v4159_v1  ;;  %v3043_v3 = vld [vmem:[%s4099_s6] ss:$12 sps:$4 sm:$0xff]   ;;  %2772 = vmatprep.subr.bf16.mxu1 %v3547_v4  ;;  %v3045_v6 = vld [vmem:[%s4099_s6 + $0x1c] ss:$12 sps:$4 sm:$0xff]   ;;  %v3047_v7 = vld [vmem:[%s4099_s6 + $0x18] ss:$12 sps:$4 sm:$0xff]  }
 0x15d   : > { %1114 = vmatprep.subr.bf16.mxu0 %v3041_v2  ;;  %v3048_v8 = vld [vmem:[%s4099_s6 + $0x20] ss:$12 sps:$4 sm:$0xff]   ;;  %2773 = vmatpush3.bf16.msra.mxu1 %v3044_v5  ;;  %v3051_v14 = vld [vmem:[%s4099_s6 + $0x30] ss:$12 sps:$4 sm:$0xff]   ;;  %v3052_v15 = vld [vmem:[%s4099_s6 + $0x38] ss:$12 sps:$4 sm:$0xff]  }
 0x15e   : > { %v3049_v9 = vld [vmem:[%s4099_s6 + $0x34] ss:$12 sps:$4 sm:$0xff]   ;;  %1115 = vmatpush1.bf16.msra.mxu0 %v3043_v3  ;;  %2774 = vmatprep.subr.bf16.mxu1 %v3547_v4  ;;  %v3053_v16 = vld [vmem:[%s4099_s6 + $0x4c] ss:$12 sps:$4 sm:$0xff]   ;;  %v3056_v18 = vld [vmem:[%s4099_s6 + $0x50] ss:$12 sps:$4 sm:$0xff]  }
 0x15f   : > { %1116 = vmatprep.subr.bf16.mxu0 %v3045_v6  ;;  %v3055_v17 = vld [vmem:[%s4099_s6 + $0x48] ss:$12 sps:$4 sm:$0xff]   ;;  %v3057_v19 = vld [vmem:[%s4099_s6 + $0x64] ss:$12 sps:$4 sm:$0xff]   ;;  %v3059_v20 = vld [vmem:[%s4099_s6 + $0x60] ss:$12 sps:$4 sm:$0xff]  }
 0x160   : > { %v3060_v21 = vld [vmem:[%s4099_s6 + $0x68] ss:$12 sps:$4 sm:$0xff]   ;;  %v3063_v23 = vld [vmem:[%s4099_s6 + $0x78] ss:$12 sps:$4 sm:$0xff]   ;;  %v3064_v24 = vld [vmem:[%s4099_s6 + $0x80] ss:$12 sps:$4 sm:$0xff]  }
 0x161   : > { %2775 = vmatpush3.bf16.msra.mxu1 %v3048_v8  ;;  %v3061_v22 = vld [vmem:[%s4099_s6 + $0x7c] ss:$12 sps:$4 sm:$0xff]   ;;  %v3065_v25 = vld [vmem:[%s4099_s6 + $0x94] ss:$12 sps:$4 sm:$0xff]   ;;  %v3548_v26 = vmov 0   ;;  %vm3549_vm0 = vmmov 0  }
 0x162   : > { %1117 = vmatpush1.bf16.msra.mxu0 %v3047_v7  ;;  %2776 = vmatprep.subr.bf16.mxu1 %v3547_v4  ;;  %v3067_v27 = vld [vmem:[%s4099_s6 + $0x90] ss:$12 sps:$4 sm:$0xff]   ;;  %v3068_v28 = vld [vmem:[%s4099_s6 + $0x98] ss:$12 sps:$4 sm:$0xff]   ;;  %v3071_v30 = vld [vmem:[%s4099_s6 + $0xa8] ss:$12 sps:$4 sm:$0xff]  }
 0x163   : > { %1118 = vmatprep.subr.bf16.mxu0 %v3049_v9  ;;  %1146 = vmatprep.mubr.bf16.mxu0 %v3548_v26  ;;  %v3069_v29 = vld [vmem:[%s4099_s6 + $0xac] ss:$12 sps:$4 sm:$0xff]   ;;  %v3072_v31 = vld [vmem:[%s4099_s6 + $0xb0] ss:$12 sps:$4 sm:$0xff]   ;;  %s4577_s11 = scalar_lea.vmem [#allocation7], %s4090_s20  ;;  %s4578_s27 = scalar_lea.vmem [#allocation9], %s4090_s20 }
 0x164   : > { %2788 = vmatprep.mubr.msk.bf16.mxu1 %vm3549_vm0, %v3547_v4  ;;  %v2610_v36 = vld [vmem:[%s4577_s11] ss:$0 sm:$0xff]  ;;  %v4208_v43 = vshrl.u32 %v971_v42, 7  ;;  %vm1198_vm1 = vcmask 261120   ;;  %s3550_s28 = smov 96   ;;  %vm1262_vm2 = vcmask 1043456  }
 0x165   : > { %2777 = vmatpush3.bf16.msra.mxu1 %v3052_v15  ;;  %v2611_v38 = vld [vmem:[%s4578_s27] ss:$0 sm:$0xff]  ;;  %vm1246_vm3 = vcmask 64512   ;;  %s3552_s1 = smov 64   ;;  %vm1425_vm4 = vcmask 523520   ;;  %vm1542_vm5 = vcmask 785920  }
 0x166   : > { %1119 = vmatpush1.bf16.msra.mxu0 %v3051_v14  ;;  %2778 = vmatprep.subr.bf16.mxu1 %v3547_v4  ;;  %v977_v44 = vsub.s32 1, %v4208_v43  ;;  %v969_v45 = vld [vmem:[%s4141_s18] sm:$0x7]  ;;  %v981_v46 = vsub.s32 2, %v4208_v43  ;;  %v973_v48 = vsub.s32 0, %v4208_v43  ;;  %s3551_s18 = smov 32  }
 0x167   : > { %1120 = vmatprep.subr.bf16.mxu0 %v3053_v16  ;;  %vm1659_vm6 = vcmask 1048320  }
 0x168   : > { %v978_v47 = vrot.slane %v969_v45, %v977_v44  ;;  %v982_v53 = vrot.slane %v969_v45, %v981_v46  ;;  %v974_v59 = vrot.slane %v969_v45, %v973_v48 }
 0x169   : > { %2779 = vmatpush3.bf16.msra.mxu1 %v3056_v18 }
 0x16a   : > { %1121 = vmatpush1.bf16.msra.mxu0 %v3055_v17  ;;  %2780 = vmatprep.subr.bf16.mxu1 %v3547_v4 }
 0x16b   : > { %1122 = vmatprep.subr.bf16.mxu0 %v3057_v19 }
 0x16d   : > { %2781 = vmatpush3.bf16.msra.mxu1 %v3060_v21 }
 0x16e   : > { %1123 = vmatpush1.bf16.msra.mxu0 %v3059_v20  ;;  %2782 = vmatprep.subr.bf16.mxu1 %v3547_v4 }
 0x16f   : > { %1124 = vmatprep.subr.bf16.mxu0 %v3061_v22 }
 0x171   : > { %2783 = vmatpush3.bf16.msra.mxu1 %v3064_v24 }
 0x172   : > { %1125 = vmatpush1.bf16.msra.mxu0 %v3063_v23  ;;  %2784 = vmatprep.subr.bf16.mxu1 %v3547_v4 }
 0x173   : > { %1126 = vmatprep.subr.bf16.mxu0 %v3065_v25 }
 0x175   : > { %2785 = vmatpush3.bf16.msra.mxu1 %v3068_v28 }
 0x176   : > { %1127 = vmatpush1.bf16.msra.mxu0 %v3067_v27  ;;  %2786 = vmatprep.subr.bf16.mxu1 %v3547_v4 }
 0x177   : > { %1128 = vmatprep.subr.bf16.mxu0 %v3069_v29 }
 0x179   : > { %2787 = vmatpush3.bf16.msra.mxu1 %v3072_v31 }
 0x17a   : > { %1129 = vmatpush1.bf16.msra.mxu0 %v3071_v30  ;;  %2792 = vmatprep.subr.bf16.mxu1 %v3547_v4 }
 0x17b   : > { %2816 = vmatprep.subr.bf16.mxu0 %v3547_v4 }
 0x1e9   : > { %v911_v10 = vpop.xlane.xlu0 %910 }
 0x1ea   : > { %v913_v11 = vmul.f32 0.0078125, %v911_v10 }
 0x1ec   : > { %v914_v12 = vsub.f32 %v4159_v1, %v913_v11 }
 0x1ee   : > { %v915_v13 = vmul.f32 %v914_v12, %v914_v12 }
 0x1f0   : > { %916 = vadd.xlane.f32.xlu0 %v915_v13 }
 0x27d   : > { %v917_v32 = vpop.xlane.xlu0 %916 }
 0x27e   : > { %v918_v33 = vmul.f32 0.0078125, %v917_v32 }
 0x280   : > { %v919_v34 = vadd.f32 1e-12, %v918_v33 }
 0x282   : > { %3121 = vrsqrt.f32 %v919_v34 }
 0x28c   : > { %v3122_v35 = vpop.eup %3121 }
 0x28d   : > { %v921_v37 = vmul.f32 %v3122_v35, %v914_v12 }
 0x28f   : > { %v928_v39 = vmul.f32 %v2610_v36, %v921_v37 }
 0x291   : > { %v935_v40 = vadd.f32 %v2611_v38, %v928_v39 }
 0x293   : > { %v936_v41 = vpack.c.bf16 %v935_v40, %v935_v40 }
 0x295   : > { %1147 = vmatmul.mubr.bf16.vlgmr.msra.gmra.mrb[0].mxu0 %v936_v41  ;;  %2789 = vmatmul.mubr.bf16.vlgmr.msra.gmra.mrb[0].mxu1 %v936_v41 }
 0x296   : > { %2794 = vmatprep.mubr.msk.bf16.mxu1 %vm3549_vm0, %v3547_v4  ;;  %2818 = vmatprep.mubr.msk.bf16.mxu0 %vm3549_vm0, %v3547_v4 }
 0x368   : > { %v1148_v49 = vpop.f32.mrb[0].mxu0  ;;  %v1189_v50 = vpop.f32.mrb[0].mxu1 }
 0x369   : > { %v1150_v51 = vpop.f32.mrb[1].mxu0  ;;  %v2790_v52 = vpop.f32.mrb[1].mxu1  ;;  %v1190_v61 = vadd.f32 %v1189_v50, %v982_v53  ;;  %v1149_v63 = vadd.f32 %v1148_v49, %v974_v59 }
 0x36a   : > { %v1151_v54 = vadd.f32 %v1150_v51, %v978_v47  ;;  %v1152_v55 = vpop.f32.mrb[2].mxu0  ;;  %v1192_v56 = vpop.f32.mrb[2].mxu1 }
 0x36b   : > { %v1153_v57 = vpop.f32.mrb[3].mxu0  ;;  %v2791_v58 = vpop.f32.mrb[3].mxu1  ;;  %v4221_v0 = vpack.c.bf16 %v1190_v61, %v1190_v61  ;;  %v1195_v2 = vpack.c.bf16 %v1149_v63, %v1149_v63 }
 0x36c   : > { %v1196_v60 = vpack.c.bf16 %v1151_v54, %v1151_v54 }
 0x36d   : > { %v1264_v3 = vsel %vm1262_vm2, %v4221_v0, 0 }
 0x36e   : > { %1311 = vrot.lane.b32.xlu0 %v1196_v60, %s3550_s28  ;;  %v1203_v62 = vsel %vm1198_vm1, %v1196_v60, 0 }
 0x36f   : > { %2793 = vmatpush3.bf16.xpose.msra.mxu1 %v1203_v62 }
 0x370   : > { %2798 = vmatprep.subr.bf16.mxu1 %v3547_v4 }
 0x372   : > { %1546 = vrot.lane.b32.xlu0 %v1196_v60, %s3551_s18 }
 0x376   : > { %2795 = vmatmul.mubr.msk.bf16.vlgmr.msra.gmra.mrb[4].mxu1 %vm1198_vm1, %v1195_v2 }
 0x377   : > { %2799 = vmatpush3.bf16.msra.mxu1 %v1264_v3  ;;  %2800 = vmatprep.mubr.msk.bf16.mxu1 %vm3549_vm0, %v3547_v4 }
 0x378   : > { %2804 = vmatprep.subr.bf16.mxu1 %v3547_v4 }
 0x3e0   : > { %v1312_v18 = vpop.permute.xlu0 %1311 }
 0x3e1   : > { %v1317_v25 = vsel %vm1198_vm1, %v1312_v18, 0 }
 0x3e4   : > { %v1547_v23 = vpop.permute.xlu0 %1546 }
 0x3e5   : > { %v1552_v28 = vsel %vm1198_vm1, %v1547_v23, 0 }
 0x449   : > { %v1239_v5 = vpop.f32.mrb[4].mxu1 }
 0x44a   : > { %v1245_v6 = vmul.f32 0.17677669, %v1239_v5  ;;  %v2796_v7 = vpop.f32.mrb[5].mxu1 }
 0x44b   : > { %v1242_v8 = vpop.f32.mrb[6].mxu1 }
 0x44c   : > { %v2797_v9 = vpop.f32.mrb[7].mxu1  ;;  %v1247_v10 = vsel %vm1246_vm3, %v1245_v6, -inf }
 0x44d   : > { %1248 = vmax.xlane.f32.xlu1 %v1247_v10 }
 0x4da   : > { %v1249_v11 = vpop.xlane.xlu1 %1248 }
 0x4db   : > { %v1250_v12 = vsub.f32 %v1245_v6, %v1249_v11 }
 0x4dd   : > { %v1251_v13 = vmul.f32 1.442695, %v1250_v12 }
 0x4df   : > { %3123 = vpow2.f32 %v1251_v13 }
 0x4e9   : > { %v3124_v14 = vpop.eup %3123 }
 0x4ea   : > { %v1253_v15 = vsel %vm1246_vm3, %v3124_v14, 0.0 }
 0x4eb   : > { %1254 = vadd.xlane.f32.xlu1 %v1253_v15 }
 0x4fc   : > { %1308 = vrot.lane.b32.xlu1 %v1195_v2, %s3550_s28 }
 0x500   : > { %1429 = vrot.lane.b32.xlu1 %v1196_v60, %s3552_s1 }
 0x504   : > { %1427 = vrot.lane.b32.xlu1 %v1195_v2, %s3552_s1 }
 0x508   : > { %1544 = vrot.lane.b32.xlu1 %v1195_v2, %s3551_s18 }
 0x578   : > { %v1255_v16 = vpop.xlane.xlu1 %1254 }
 0x579   : > { %3125 = vrcp.f32 %v1255_v16 }
 0x57c   : > { %v1309_v17 = vpop.permute.xlu1 %1308 }
 0x580   : > { %v1430_v19 = vpop.permute.xlu1 %1429 }
 0x581   : > { %v1435_v20 = vsel %vm1198_vm1, %v1430_v19, 0 }
 0x582   : > { %2817 = vmatpush3.bf16.xpose.msra.mxu0 %v1435_v20 }
 0x583   : > { %v3126_v21 = vpop.eup %3125  ;;  %2828 = vmatprep.subr.bf16.mxu0 %v3547_v4 }
 0x584   : > { %v1257_v22 = vmul.f32 %v3126_v21, %v3124_v14  ;;  %v1428_v27 = vpop.permute.xlu1 %1427 }
 0x586   : > { %v1258_v24 = vpack.c.bf16 %v1257_v22, %v1257_v22 }
 0x588   : > { %2801 = vmatmul.mubr.msk.bf16.vlgmr.msra.gmra.mrb[8].mxu1 %vm1246_vm3, %v1258_v24  ;;  %v1545_v29 = vpop.permute.xlu1 %1544 }
 0x589   : > { %2805 = vmatpush3.bf16.xpose.msra.mxu1 %v1317_v25  ;;  %2819 = vmatmul.mubr.msk.bf16.vlgmr.msra.gmra.mrb[4].mxu0 %vm1198_vm1, %v1428_v27  ;;  %v3073_v27 = vld [vmem:[%s4107_s15] sm:$0xff]  }
 0x58a   : > { %2829 = vmatpush3.bf16.xpose.msra.mxu0 %v1552_v28  ;;  %2806 = vmatprep.mubr.msk.bf16.mxu1 %vm3549_vm0, %v3547_v4  ;;  %v3074_v28 = vld [vmem:[%s4107_s15 + $0x8] sm:$0xff]  }
 0x58b   : > { %2830 = vmatprep.mubr.msk.bf16.mxu0 %vm3549_vm0, %v3547_v4  ;;  %2810 = vmatprep.subr.bf16.mxu1 %v3547_v4 }
 0x58c   : > { %2840 = vmatprep.subr.bf16.mxu0 %v3547_v4 }
 0x590   : > { %2807 = vmatmul.mubr.msk.bf16.vlgmr.msra.gmra.mrb[12].mxu1 %vm1198_vm1, %v1309_v17 }
 0x591   : > { %2831 = vmatmul.mubr.msk.bf16.vlgmr.msra.gmra.mrb[8].mxu0 %vm1198_vm1, %v1545_v29  ;;  %2812 = vmatprep.mubr.msk.bf16.mxu1 %vm3549_vm0, %v3547_v4  ;;  %v3075_v29 = vld [vmem:[%s4107_s15 + $0x10] sm:$0xff]  }
 0x592   : > { %2856 = vmatprep.mubr.msk.bf16.mxu0 %vm3549_vm0, %v3547_v4  ;;  %2841 = vmatpush3.bf16.msra.mxu0 %v3073_v27 }
 0x593   : > { %2842 = vmatprep.subr.bf16.mxu0 %v3547_v4 }
 0x596   : > { %2843 = vmatpush3.bf16.msra.mxu0 %v3074_v28  ;;  %v3105_v28 = vld [vmem:[%s4115_s2 + $0x40] sm:$0xff]  }
 0x597   : > { %2844 = vmatprep.subr.bf16.mxu0 %v3547_v4 }
 0x59a   : > { %2845 = vmatpush3.bf16.msra.mxu0 %v3075_v29  ;;  %v3106_v29 = vld [vmem:[%s4115_s2] sm:$0xff]  }
 0x59b   : > { %2846 = vmatprep.subr.bf16.mxu0 %v3547_v4 }
 0x65b   : > { %v1300_v30 = vpop.f32.mrb[8].mxu1 }
 0x65c   : > { %1306 = vst.msk [vmem:[#allocation3] sm:$0xff] %vm1198_vm1, %v1300_v30  ;;  %v2802_v31 = vpop.f32.mrb[9].mxu1  ;;  %v1471_v32 = vpop.f32.mrb[4].mxu0  ;;  %v3076_v30 = vld [vmem:[%s4107_s15 + $0x18] sm:$0xff]  }
 0x65d   : > { %v1477_v33 = vmul.f32 0.17677669, %v1471_v32  ;;  %v1303_v34 = vpop.f32.mrb[10].mxu1  ;;  %v2820_v35 = vpop.f32.mrb[5].mxu0  ;;  %2847 = vmatpush3.bf16.msra.mxu0 %v3076_v30  ;;  %v3077_v31 = vld [vmem:[%s4107_s15 + $0x20] sm:$0xff]   ;;  %v3107_v30 = vld [vmem:[%s4115_s2 + $0x48] sm:$0xff]  }
 0x65e   : > { %v2803_v36 = vpop.f32.mrb[11].mxu1  ;;  %v1474_v37 = vpop.f32.mrb[6].mxu0  ;;  %2848 = vmatprep.subr.bf16.mxu0 %v3547_v4 }
 0x65f   : > { %v2821_v38 = vpop.f32.mrb[7].mxu0  ;;  %v1478_v39 = vsel %vm1246_vm3, %v1477_v33, -inf  ;;  %v3079_v36 = vld [vmem:[%s4107_s15 + $0x30] sm:$0xff]   ;;  %v3080_v37 = vld [vmem:[%s4107_s15 + $0x38] sm:$0xff]  }
 0x660   : > { %1479 = vmax.xlane.f32.xlu1 %v1478_v39 }
 0x661   : > { %2849 = vmatpush3.bf16.msra.mxu0 %v3077_v31  ;;  %v3108_v31 = vld [vmem:[%s4115_s2 + $0x8] sm:$0xff]  }
 0x662   : > { %2850 = vmatprep.subr.bf16.mxu0 %v3547_v4 }
 0x663   : > { %v1353_v40 = vpop.f32.mrb[12].mxu1 }
 0x664   : > { %v1359_v41 = vmul.f32 0.17677669, %v1353_v40  ;;  %v2808_v42 = vpop.f32.mrb[13].mxu1  ;;  %v1588_v45 = vpop.f32.mrb[8].mxu0 }
 0x665   : > { %v1356_v46 = vpop.f32.mrb[14].mxu1  ;;  %v2832_v47 = vpop.f32.mrb[9].mxu0  ;;  %v1594_v49 = vmul.f32 0.17677669, %v1588_v45 }
 0x666   : > { %v2809_v50 = vpop.f32.mrb[15].mxu1  ;;  %v1591_v51 = vpop.f32.mrb[10].mxu0  ;;  %v1360_v52 = vsel %vm1246_vm3, %v1359_v41, -inf }
 0x667   : > { %v2833_v53 = vpop.f32.mrb[11].mxu0  ;;  %1361 = vmax.xlane.f32.xlu0 %v1360_v52  ;;  %v1595_v54 = vsel %vm1246_vm3, %v1594_v49, -inf }
 0x66b   : > { %1596 = vmax.xlane.f32.xlu0 %v1595_v54  ;;  %v2652_v54 = vld [vmem:[%s886_s22] ss:$0 sm:$0xff] }
 0x6ed   : > { %v1480_v55 = vpop.xlane.xlu1 %1479 }
 0x6ee   : > { %v1481_v56 = vsub.f32 %v1477_v33, %v1480_v55 }
 0x6f0   : > { %v1482_v57 = vmul.f32 1.442695, %v1481_v56 }
 0x6f2   : > { %3127 = vpow2.f32 %v1482_v57 }
 0x6f4   : > { %v1362_v58 = vpop.xlane.xlu0 %1361 }
 0x6f5   : > { %v1363_v59 = vsub.f32 %v1359_v41, %v1362_v58 }
 0x6f7   : > { %v1364_v60 = vmul.f32 1.442695, %v1363_v59 }
 0x6f8   : > { %v1597_v61 = vpop.xlane.xlu0 %1596 }
 0x6f9   : > { %3129 = vpow2.f32 %v1364_v60  ;;  %v1598_v62 = vsub.f32 %v1594_v49, %v1597_v61  ;;  %v3081_v60 = vld [vmem:[%s4109_s16] ss:$8 sps:$4 sm:$0xff]   ;;  %v3083_v61 = vld [vmem:[%s4109_s16 + $0x4] ss:$8 sps:$4 sm:$0xff]  }
 0x6fb   : > { %v1599_v63 = vmul.f32 1.442695, %v1598_v62  ;;  %v3086_v62 = vld [vmem:[%s4109_s16 + $0x14] ss:$8 sps:$4 sm:$0xff]  }
 0x6fc   : > { %v3128_v2 = vpop.eup %3127 }
 0x6fd   : > { %3131 = vpow2.f32 %v1599_v63  ;;  %v1484_v3 = vsel %vm1246_vm3, %v3128_v2, 0.0  ;;  %v3084_v63 = vld [vmem:[%s4109_s16 + $0x10] ss:$8 sps:$4 sm:$0xff]  }
 0x6fe   : > { %1485 = vadd.xlane.f32.xlu0 %v1484_v3 }
 0x703   : > { %v3130_v5 = vpop.eup %3129 }
 0x704   : > { %v1366_v6 = vsel %vm1246_vm3, %v3130_v5, 0.0 }
 0x705   : > { %1367 = vadd.xlane.f32.xlu0 %v1366_v6 }
 0x707   : > { %v3132_v7 = vpop.eup %3131 }
 0x708   : > { %v1601_v8 = vsel %vm1246_vm3, %v3132_v7, 0.0 }
 0x709   : > { %1602 = vadd.xlane.f32.xlu1 %v1601_v8  ;;  %v3092_v8 = vld [vmem:[%s4109_s16 + $0x34] ss:$8 sps:$4 sm:$0xff]  }
 0x71a   : > { %1490 = vrot.lane.b32.xlu1 %v4221_v0, %s3552_s1 }
 0x71b   : > { %1373 = vrot.lane.b32.xlu0 %v4221_v0, %s3550_s28 }
 0x71e   : > { %1607 = vrot.lane.b32.xlu1 %v4221_v0, %s3551_s18 }
 0x78b   : > { %v1486_v9 = vpop.xlane.xlu0 %1485 }
 0x792   : > { %v1368_v10 = vpop.xlane.xlu0 %1367 }
 0x793   : > { %3133 = vrcp.f32 %v1368_v10  ;;  %v3095_v10 = vld [vmem:[%s4109_s16 + $0x44] ss:$8 sps:$4 sm:$0xff]  }
 0x794   : > { %3135 = vrcp.f32 %v1486_v9  ;;  %v3090_v9 = vld [vmem:[%s4109_s16 + $0x30] ss:$8 sps:$4 sm:$0xff]  }
 0x796   : > { %v1374_v11 = vpop.permute.xlu0 %1373  ;;  %v1603_v13 = vpop.xlane.xlu1 %1602 }
 0x797   : > { %v1379_v12 = vsel %vm1262_vm2, %v1374_v11, 0  ;;  %3137 = vrcp.f32 %v1603_v13  ;;  %v3093_v11 = vld [vmem:[%s4109_s16 + $0x40] ss:$8 sps:$4 sm:$0xff]   ;;  %v3096_v13 = vld [vmem:[%s4109_s16 + $0x50] ss:$8 sps:$4 sm:$0xff]  }
 0x798   : > { %2811 = vmatpush3.bf16.msra.mxu1 %v1379_v12  ;;  %v3098_v12 = vld [vmem:[%s4109_s16 + $0x54] ss:$8 sps:$4 sm:$0xff]  }
 0x799   : > { %2822 = vmatprep.subr.bf16.mxu1 %v3547_v4 }
 0x79a   : > { %v1491_v16 = vpop.permute.xlu1 %1490 }
 0x79b   : > { %v1496_v19 = vsel %vm1262_vm2, %v1491_v16, 0  ;;  %v3104_v16 = vld [vmem:[%s4109_s16 + $0x74] ss:$8 sps:$4 sm:$0xff]  }
 0x79d   : > { %v3134_v14 = vpop.eup %3133 }
 0x79e   : > { %v1370_v15 = vmul.f32 %v3134_v14, %v3130_v5  ;;  %v3136_v18 = vpop.eup %3135  ;;  %v1608_v20 = vpop.permute.xlu1 %1607  ;;  %v3101_v14 = vld [vmem:[%s4109_s16 + $0x64] ss:$8 sps:$4 sm:$0xff]  }
 0x79f   : > { %v1488_v0 = vmul.f32 %v3136_v18, %v3128_v2  ;;  %v1613_v23 = vsel %vm1262_vm2, %v1608_v20, 0  ;;  %v3089_v2 = vld [vmem:[%s4109_s16 + $0x24] ss:$8 sps:$4 sm:$0xff]  }
 0x7a0   : > { %v1371_v17 = vpack.c.bf16 %v1370_v15, %v1370_v15  ;;  %v3099_v15 = vld [vmem:[%s4109_s16 + $0x60] ss:$8 sps:$4 sm:$0xff]  }
 0x7a1   : > { %v1489_v21 = vpack.c.bf16 %v1488_v0, %v1488_v0  ;;  %v3138_v22 = vpop.eup %3137 }
 0x7a2   : > { %2813 = vmatmul.mubr.msk.bf16.vlgmr.msra.gmra.mrb[16].mxu1 %vm1246_vm3, %v1371_v17  ;;  %v1605_v24 = vmul.f32 %v3138_v22, %v3132_v7  ;;  %v3102_v17 = vld [vmem:[%s4109_s16 + $0x70] ss:$8 sps:$4 sm:$0xff]  }
 0x7a3   : > { %2823 = vmatpush3.bf16.msra.mxu1 %v1496_v19  ;;  %2824 = vmatprep.mubr.msk.bf16.mxu1 %vm3549_vm0, %v3547_v4 }
 0x7a4   : > { %2834 = vmatprep.subr.bf16.mxu1 %v3547_v4  ;;  %v1606_v25 = vpack.c.bf16 %v1605_v24, %v1605_v24 }
 0x7aa   : > { %2825 = vmatmul.mubr.msk.bf16.vlgmr.msra.gmra.mrb[20].mxu1 %vm1246_vm3, %v1489_v21  ;;  %v2653_v21 = vld [vmem:[%s889_s14] ss:$0 sm:$0xff] }
 0x7ab   : > { %2835 = vmatpush3.bf16.msra.mxu1 %v1613_v23  ;;  %2836 = vmatprep.mubr.msk.bf16.mxu1 %vm3549_vm0, %v3547_v4  ;;  %v2654_v23 = vld [vmem:[%s892_s19] ss:$0 sm:$0xff] }
 0x7ac   : > { %1912 = vmatprep.subr.bf16.mxu1 %v3083_v61 }
 0x7b2   : > { %2837 = vmatmul.mubr.msk.bf16.vlgmr.msra.gmra.mrb[24].mxu1 %vm1246_vm3, %v1606_v25 }
 0x7b3   : > { %1944 = vmatprep.mubr.bf16.mxu1 %v3548_v26  ;;  %v3078_v26 = vld [vmem:[%s4107_s15 + $0x28] sm:$0xff]   ;;  %1913 = vmatpush1.bf16.msra.mxu1 %v3081_v60 }
 0x7b4   : > { %2851 = vmatpush3.bf16.msra.mxu0 %v3078_v26  ;;  %1914 = vmatprep.subr.bf16.mxu1 %v3086_v62  ;;  %v3109_v26 = vld [vmem:[%s4115_s2 + $0x50] sm:$0xff]  }
 0x7b5   : > { %2852 = vmatprep.subr.bf16.mxu0 %v3547_v4 }
 0x7b7   : > { %1915 = vmatpush1.bf16.msra.mxu1 %v3084_v63 }
 0x7b8   : > { %2853 = vmatpush3.bf16.msra.mxu0 %v3079_v36  ;;  %1916 = vmatprep.subr.bf16.mxu1 %v3089_v2  ;;  %v3114_v36 = vld [vmem:[%s4115_s2 + $0x20] sm:$0xff]  }
 0x7b9   : > { %2854 = vmatprep.subr.bf16.mxu0 %v3547_v4 }
 0x7bc   : > { %2855 = vmatpush3.bf16.msra.mxu0 %v3080_v37  ;;  %v3115_v37 = vld [vmem:[%s4115_s2 + $0x68] sm:$0xff]  }
 0x7bd   : > { %2741 = vmatprep.subr.bf16.mxu0 %v3105_v28 }
 0x875   : > { %v1415_v32 = vpop.f32.mrb[16].mxu1 }
 0x876   : > { %1422 = vrot.lane.b32.xlu1 %v1415_v32, %s3551_s18  ;;  %v2814_v33 = vpop.f32.mrb[17].mxu1  ;;  %v3110_v32 = vld [vmem:[%s4115_s2 + $0x10] sm:$0xff]  }
 0x877   : > { %v1418_v34 = vpop.f32.mrb[18].mxu1  ;;  %v3111_v33 = vld [vmem:[%s4115_s2 + $0x58] sm:$0xff]  }
 0x878   : > { %v2815_v35 = vpop.f32.mrb[19].mxu1  ;;  %v3112_v34 = vld [vmem:[%s4115_s2 + $0x18] sm:$0xff]  }
 0x879   : > { %v3113_v35 = vld [vmem:[%s4115_s2 + $0x60] sm:$0xff]  }
 0x87d   : > { %v1532_v38 = vpop.f32.mrb[20].mxu1 }
 0x87e   : > { %1539 = vrot.lane.b32.xlu0 %v1532_v38, %s3552_s1  ;;  %v2826_v39 = vpop.f32.mrb[21].mxu1  ;;  %v3116_v38 = vld [vmem:[%s4115_s2 + $0x28] sm:$0xff]  }
 0x87f   : > { %v1535_v40 = vpop.f32.mrb[22].mxu1  ;;  %v3117_v39 = vld [vmem:[%s4115_s2 + $0x70] sm:$0xff]  }
 0x880   : > { %v2827_v41 = vpop.f32.mrb[23].mxu1  ;;  %v3118_v40 = vld [vmem:[%s4115_s2 + $0x30] sm:$0xff]  }
 0x881   : > { %v3119_v41 = vld [vmem:[%s4115_s2 + $0x78] sm:$0xff]  }
 0x885   : > { %v1649_v42 = vpop.f32.mrb[24].mxu1 }
 0x886   : > { %1656 = vrot.lane.b32.xlu1 %v1649_v42, %s3550_s28  ;;  %v2838_v45 = vpop.f32.mrb[25].mxu1  ;;  %v3120_v42 = vld [vmem:[%s4115_s2 + $0x38] sm:$0xff]   ;;  %s4583_s2 = sld [smem:[#allocation30_spill]] }
 0x887   : > { %v1652_v46 = vpop.f32.mrb[26].mxu1  ;;  %v1820_v45 = vld [vmem:[%s4147_s9] sm:$0x3] }
 0x888   : > { %v2839_v47 = vpop.f32.mrb[27].mxu1  ;;  %v1825_v46 = vrot.slane %v1820_v45, %v973_v48 }
 0x889   : > { %v1829_v47 = vrot.slane %v1820_v45, %v977_v44 }
 0x88c   : > { %p2688_p13 = scmp.ne.s32.totalorder %s4583_s2, 1 }
 0x88d   : > { %vm3554_vm7 = vmmov (!%p2688_p13), 0   ;;  %v3151_v28 = vld [vmem:[#allocation16 + $0x30] sm:$0xff] (!%p2688_p13)   ;;  %s4584_s21 = sld [smem:[#allocation55_spill]] (!%p2688_p13)  ;;  %s4585_s26 = sld [smem:[#allocation56_spill]] (!%p2688_p13) }
 0x88e   : > { %s4586_s0 = sld [smem:[#allocation58_spill]] (!%p2688_p13) }
 0x8e8   : > { %v1423_v49 = vpop.permute.xlu1 %1422 }
 0x8e9   : > { %1426 = vst.msk [vmem:[#allocation3] sm:$0xff] %vm1425_vm4, %v1423_v49 }
 0x8f0   : > { %v1540_v50 = vpop.permute.xlu0 %1539 }
 0x8f1   : > { %1543 = vst.msk [vmem:[#allocation3] sm:$0xff] %vm1542_vm5, %v1540_v50 }
 0x8f8   : > { %v1657_v4 = vpop.permute.xlu1 %1656 }
 0x8f9   : > { %1660 = vst.msk [vmem:[#allocation3] sm:$0xff] %vm1659_vm6, %v1657_v4 }
 0x900   : > { %v1661_v51 = vld [vmem:[#allocation3] sm:$0xff] }
 0x901   : > { %v1662_v52 = vpack.c.bf16 %v1661_v51, %v1661_v51 }
 0x903   : > { %2857 = vmatmul.mubr.bf16.vlgmr.msra.gmra.mrb[12].mxu0 %v1662_v52 }
 0x904   : > { %2742 = vmatpush3.bf16.msra.mxu0 %v3106_v29  ;;  %v3152_v29 = vld [vmem:[#allocation16 + $0x38] sm:$0xff] (!%p2688_p13)  }
 0x905   : > { %2743 = vmatprep.subr.bf16.mxu0 %v3107_v30 }
 0x908   : > { %2744 = vmatpush3.bf16.msra.mxu0 %v3108_v31 }
 0x909   : > { %2745 = vmatprep.subr.bf16.mxu0 %v3109_v26 }
 0x90c   : > { %2746 = vmatpush3.bf16.msra.mxu0 %v3110_v32 }
 0x90d   : > { %2747 = vmatprep.subr.bf16.mxu0 %v3111_v33  ;;  %v2689_v33 = vld [vmem:[%s4584_s21] ss:$0 sm:$0xff] (!%p2688_p13) }
 0x910   : > { %2748 = vmatpush3.bf16.msra.mxu0 %v3112_v34 }
 0x911   : > { %2749 = vmatprep.subr.bf16.mxu0 %v3113_v35  ;;  %v2690_v35 = vld [vmem:[%s4585_s26] ss:$0 sm:$0xff] (!%p2688_p13) }
 0x914   : > { %2750 = vmatpush3.bf16.msra.mxu0 %v3114_v36 }
 0x915   : > { %2751 = vmatprep.subr.bf16.mxu0 %v3115_v37 }
 0x918   : > { %2752 = vmatpush3.bf16.msra.mxu0 %v3116_v38 }
 0x919   : > { %2753 = vmatprep.subr.bf16.mxu0 %v3117_v39  ;;  %v2691_v39 = vld [vmem:[%s4586_s0] ss:$0 sm:$0xff] (!%p2688_p13) }
 0x91c   : > { %2754 = vmatpush3.bf16.msra.mxu0 %v3118_v40 }
 0x91d   : > { %2755 = vmatprep.subr.bf16.mxu0 %v3119_v41 }
 0x920   : > { %2756 = vmatpush3.bf16.msra.mxu0 %v3120_v42 }
 0x9d6   : > { %v1761_v53 = vpop.f32.mrb[12].mxu0 }
 0x9d7   : > { %v1767_v55 = vadd.f32 %v1761_v53, %v4159_v1  ;;  %v2858_v56 = vpop.f32.mrb[13].mxu0  ;;  %v3087_v1 = vld [vmem:[%s4109_s16 + $0x20] ss:$8 sps:$4 sm:$0xff]  }
 0x9d8   : > { %v1764_v57 = vpop.f32.mrb[14].mxu0  ;;  %1917 = vmatpush1.bf16.msra.mxu1 %v3087_v1 }
 0x9d9   : > { %v4304_v58 = vadd.f32 %v2652_v54, %v1767_v55  ;;  %v2859_v59 = vpop.f32.mrb[15].mxu0  ;;  %1918 = vmatprep.subr.bf16.mxu1 %v3092_v8 }
 0x9db   : > { %1778 = vadd.xlane.f32.xlu0 %v4304_v58 }
 0x9dc   : > { %1919 = vmatpush1.bf16.msra.mxu1 %v3090_v9 }
 0x9dd   : > { %1920 = vmatprep.subr.bf16.mxu1 %v3095_v10 }
 0x9e0   : > { %1921 = vmatpush1.bf16.msra.mxu1 %v3093_v11  ;;  %v2671_v11 = vld [vmem:[%s899_s3] ss:$0 sm:$0xff] }
 0x9e1   : > { %1922 = vmatprep.subr.bf16.mxu1 %v3098_v12 }
 0x9e4   : > { %1923 = vmatpush1.bf16.msra.mxu1 %v3096_v13 }
 0x9e5   : > { %1924 = vmatprep.subr.bf16.mxu1 %v3101_v14 }
 0x9e8   : > { %1925 = vmatpush1.bf16.msra.mxu1 %v3099_v15 }
 0x9e9   : > { %1926 = vmatprep.subr.bf16.mxu1 %v3104_v16 }
 0x9ec   : > { %1927 = vmatpush1.bf16.msra.mxu1 %v3102_v17 }
 0xa68   : > { %v1779_v3 = vpop.xlane.xlu0 %1778 }
 0xa69   : > { %v1780_v5 = vmul.f32 0.0078125, %v1779_v3 }
 0xa6b   : > { %v1781_v6 = vsub.f32 %v4304_v58, %v1780_v5 }
 0xa6d   : > { %v1782_v7 = vmul.f32 %v1781_v6, %v1781_v6 }
 0xa6f   : > { %1783 = vadd.xlane.f32.xlu1 %v1782_v7 }
 0xafc   : > { %v1784_v18 = vpop.xlane.xlu1 %1783 }
 0xafd   : > { %v1785_v19 = vmul.f32 0.0078125, %v1784_v18  ;;  %v3145_v18 = vld [vmem:[#allocation16] sm:$0xff] (!%p2688_p13)  }
 0xaff   : > { %v1786_v0 = vadd.f32 1e-12, %v1785_v19  ;;  %v3553_v19 = vmov (!%p2688_p13), 0.0  }
 0xb00   : > { %2860 = vmatprep.subr.bf16.mxu0 (!%p2688_p13), %v3553_v19 }
 0xb01   : > { %3139 = vrsqrt.f32 %v1786_v0  ;;  %v3146_v0 = vld [vmem:[#allocation16 + $0x8] sm:$0xff] (!%p2688_p13)  }
 0xb0b   : > { %v3140_v20 = vpop.eup %3139 }
 0xb0c   : > { %v1788_v22 = vmul.f32 %v3140_v20, %v1781_v6 }
 0xb0e   : > { %v1795_v24 = vmul.f32 %v2653_v21, %v1788_v22 }
 0xb10   : > { %v1802_v25 = vadd.f32 %v2654_v23, %v1795_v24  ;;  %v3147_v24 = vld [vmem:[#allocation16 + $0x10] sm:$0xff] (!%p2688_p13)  }
 0xb12   : > { %v1803_v27 = vpack.c.bf16 %v1802_v25, %v1802_v25  ;;  %v3149_v25 = vld [vmem:[#allocation16 + $0x20] sm:$0xff] (!%p2688_p13)  }
 0xb14   : > { %1945 = vmatmul.mubr.bf16.vlgmr.msra.gmra.mrb[28].mxu1 %v1803_v27  ;;  %v3150_v27 = vld [vmem:[#allocation16 + $0x28] sm:$0xff] (!%p2688_p13)  }
 0xbe7   : > { %v1946_v49 = vpop.f32.mrb[28].mxu1 }
 0xbe8   : > { %v1947_v50 = vadd.f32 %v1946_v49, %v1825_v46  ;;  %v1948_v4 = vpop.f32.mrb[29].mxu1 }
 0xbe9   : > { %v1949_v51 = vadd.f32 %v1948_v4, %v1829_v47  ;;  %v1950_v52 = vpop.f32.mrb[30].mxu1 }
 0xbea   : > { %v1955_v53 = vmul.f32 0.044715, %v1947_v50  ;;  %v1951_v54 = vpop.f32.mrb[31].mxu1  ;;  %v1953_v48 = vmul.f32 0.5, %v1947_v50 }
 0xbeb   : > { %v1956_v55 = vmul.f32 0.044715, %v1949_v51  ;;  %v1954_v3 = vmul.f32 0.5, %v1949_v51 }
 0xbec   : > { %v1957_v56 = vmul.f32 %v1955_v53, %v1947_v50 }
 0xbed   : > { %v1958_v57 = vmul.f32 %v1956_v55, %v1949_v51 }
 0xbee   : > { %v1959_v59 = vmul.f32 %v1957_v56, %v1947_v50 }
 0xbef   : > { %v1960_v60 = vmul.f32 %v1958_v57, %v1949_v51 }
 0xbf0   : > { %v1961_v61 = vadd.f32 %v1959_v59, %v1947_v50 }
 0xbf1   : > { %v1962_v62 = vadd.f32 %v1960_v60, %v1949_v51 }
 0xbf2   : > { %v1963_v63 = vmul.f32 0.7978846, %v1961_v61 }
 0xbf3   : > { %v1964_v2 = vmul.f32 0.7978846, %v1962_v62 }
 0xbf4   : > { %3141 = vtanh.f32 %v1963_v63 }
 0xbf5   : > { %3143 = vtanh.f32 %v1964_v2 }
 0xbfe   : > { %v3142_v43 = vpop.eup %3141 }
 0xbff   : > { %v3144_v44 = vpop.eup %3143  ;;  %v1967_v1 = vadd.f32 1.0, %v3142_v43 }
 0xc00   : > { %v1968_v5 = vadd.f32 1.0, %v3144_v44 }
 0xc01   : > { %v1969_v6 = vmul.f32 %v1967_v1, %v1953_v48 }
 0xc02   : > { %v1970_v7 = vmul.f32 %v1968_v5, %v1954_v3 }
 0xc03   : > { %v1971_v9 = vpack.c.bf16 %v1969_v6, %v1969_v6 }
 0xc04   : > { %v1972_v8 = vpack.c.bf16 %v1970_v7, %v1970_v7 }
 0xc06   : > { %2140 = vmatprep.mubr.bf16.mxu0 %v1972_v8 }
 0xc07   : > { %2141 = vmatmul.mubr.bf16.vlgmr.msra.gmra.mrb[16].mxu0 %v1971_v9 }
 0xc08   : > { %2861 = vmatpush3.bf16.msra.mxu0 (!%p2688_p13), %v3145_v18  ;;  %2876 = vmatprep.mubr.msk.bf16.mxu0 (!%p2688_p13), %vm3554_vm7, %v3553_v19 }
 0xc09   : > { %2862 = vmatprep.subr.bf16.mxu0 (!%p2688_p13), %v3553_v19 }
 0xc0c   : > { %2863 = vmatpush3.bf16.msra.mxu0 (!%p2688_p13), %v3146_v0 }
 0xc0d   : > { %2864 = vmatprep.subr.bf16.mxu0 (!%p2688_p13), %v3553_v19 }
 0xc10   : > { %2865 = vmatpush3.bf16.msra.mxu0 (!%p2688_p13), %v3147_v24 }
 0xc11   : > { %2866 = vmatprep.subr.bf16.mxu0 (!%p2688_p13), %v3553_v19 }
 0xcda   : > { %v2757_v10 = vpop.f32.mrb[16].mxu0 }
 0xcdb   : > { %v2758_v12 = vpop.f32.mrb[17].mxu0 }
 0xcdc   : > { %v2759_v13 = vadd.f32 %v2758_v12, %v2757_v10  ;;  %v2760_v14 = vpop.f32.mrb[18].mxu0  ;;  %2153 = sbr.rel (%p2688_p13) target bundleno = 3826 (0xef2), region = 128 }
 0xcdd   : > { %v2761_v15 = vpop.f32.mrb[19].mxu0 }
 0xcde   : > { %v2143_v16 = vadd.f32 %v2759_v13, %v2671_v11 }
 0xce0   : > { %v2148_v17 = vadd.f32 %v2143_v16, %v4304_v58  ;;  %v3148_v58 = vld [vmem:[#allocation16 + $0x18] sm:$0xff] (!%p2688_p13)  }
 0xce1   : > { %2867 = vmatpush3.bf16.msra.mxu0 (!%p2688_p13), %v3148_v58 }
 0xce2   : > { %2149 = vst [vmem:[#allocation2] sm:$0xff] %v2148_v17  ;;  %2156 = vadd.xlane.f32.xlu0 (!%p2688_p13), %v2148_v17  ;;  %2868 = vmatprep.subr.bf16.mxu0 (!%p2688_p13), %v3553_v19 }
 0xce5   : > { %2869 = vmatpush3.bf16.msra.mxu0 %v3149_v25 }
 0xce6   : > { %2870 = vmatprep.subr.bf16.mxu0 %v3553_v19 }
 0xce9   : > { %2871 = vmatpush3.bf16.msra.mxu0 %v3150_v27 }
 0xcea   : > { %2872 = vmatprep.subr.bf16.mxu0 %v3553_v19 }
 0xced   : > { %2873 = vmatpush3.bf16.msra.mxu0 %v3151_v28 }
 0xcee   : > { %2874 = vmatprep.subr.bf16.mxu0 %v3553_v19 }
 0xcf1   : > { %2875 = vmatpush3.bf16.msra.mxu0 %v3152_v29 }
 0xd6f   : > { %v2157_v20 = vpop.xlane.xlu0 %2156 }
 0xd70   : > { %v2158_v21 = vmul.f32 0.0078125, %v2157_v20 }
 0xd72   : > { %v2159_v22 = vsub.f32 %v2148_v17, %v2158_v21 }
 0xd74   : > { %v2160_v23 = vmul.f32 %v2159_v22, %v2159_v22 }
 0xd76   : > { %2161 = vadd.xlane.f32.xlu0 %v2160_v23 }
 0xe03   : > { %v2162_v30 = vpop.xlane.xlu0 %2161 }
 0xe04   : > { %v2163_v31 = vmul.f32 0.0078125, %v2162_v30 }
 0xe06   : > { %v2164_v26 = vadd.f32 1e-12, %v2163_v31 }
 0xe08   : > { %3153 = vrsqrt.f32 %v2164_v26 }
 0xe12   : > { %v3154_v32 = vpop.eup %3153 }
 0xe13   : > { %v2166_v34 = vmul.f32 %v3154_v32, %v2159_v22 }
 0xe15   : > { %v2173_v36 = vmul.f32 %v2689_v33, %v2166_v34 }
 0xe17   : > { %v2180_v37 = vadd.f32 %v2690_v35, %v2173_v36 }
 0xe19   : > { %v2181_v38 = vpack.c.bf16 %v2180_v37, %v2180_v37 }
 0xe1b   : > { %2877 = vmatmul.mubr.bf16.vlgmr.msra.gmra.mrb[0].mxu0 %v2181_v38 }
 0xeee   : > { %v2287_v40 = vpop.f32.mrb[0].mxu0 }
 0xeef   : > { %v2288_v41 = vadd.f32 %v2691_v39, %v2287_v40  ;;  %v2878_v42 = vpop.f32.mrb[1].mxu0 }
 0xef0   : > { %v2290_v45 = vpop.f32.mrb[2].mxu0 }
 0xef1   : > { %2293 = vst [vmem:[%s4155_s29] sm:$0xff] %v2288_v41  ;;  %v2879_v46 = vpop.f32.mrb[3].mxu0 }
 0xef2 PF: > { %s4587_s3 = sld [smem:[#allocation31_spill]]  ;;  %s4588_s23 = sld [smem:[#allocation39_spill]] }
 0xef3   : > { %s4589_s18 = sld [smem:[#allocation59_spill]]  ;;  %s2308_s30 = sshll.u32 %s4155_s29, 4  ;;  %s2309_s30 = int_to_ptr.vmem [resolvable:$true] %s2308_s30 }
 0xef4   : > { %s2295_s5 = scalar_lea.sflag [#allocation6], %s4076_s7  ;;  %s3393_s17 = scalar_lea.vmem %s2309_s30, 128 }
 0xef5   : > { %p3394_p6 = scmp.ne.s32.totalorder %s2309_s30, %s3393_s17  ;;  %s3555_s20 = smov [#allocation18]  }
 0xef6   : > { %s3397_s25 = sshll.u32 %s3555_s20, 4  ;;  %s3398_s25 = int_to_ptr.vmem [resolvable:$false] %s3397_s25 }
 0xef7   : > { %s3399_s24 = scalar_lea.vmem %s3398_s25, 256  ;;  %p3400_p3 = scmp.lt.s32.totalorder %s2309_s30, %s3398_s25 }
 0xef8   : > { %s2701_s11 = sshll.u32 %s4587_s3, 7  ;;  %p4591_p1 = scmp.ne.s32.totalorder %s4588_s23, 0 }
 0xef9   : > { %s4590_s13 = smov %s4589_s18  ;;  %s4376_s1 = scalar_lea.hbm %s4589_s18, %s2701_s11 }
 0xefa   : > { %p3395_p4 = pnand %p3394_p6, %p4591_p1  ;;  %p3401_p5 = scmp.lt.s32.totalorder %s3399_s24, %s3393_s17 }
 0xefc   : > { %p3396_p12 = pneg %p3395_p4  ;;  %p3402_p11 = por %p3401_p5, %p3400_p3 }
 0xefe   : > { %p3403_p2 = pnand %p3402_p11, %p3396_p12 }
 0xf00   : > { %3406 = shalt.err (!%p3403_p2)
}
 0xf01   : > { %s3407_s7 = scalar_lea.hbm %s4376_s1, 128  ;;  %s3411_s15 = scalar_lea.hbm %s4590_s13, 256 }
 0xf02   : > { %p3408_p10 = scmp.ne.s32.totalorder %s4376_s1, %s3407_s7  ;;  %p3412_p9 = scmp.lt.u32.totalorder %s4376_s1, %s4590_s13 }
 0xf03   : > { %p3413_p8 = scmp.lt.u32.totalorder %s3411_s15, %s3407_s7  ;;  %p3415_p6 = scmp.lt.u32.totalorder %s3407_s7, %s4376_s1 }
 0xf04   : > { %p3409_p7 = pnand %p3408_p10, %p4591_p1 }
 0xf05   : > { %p3414_p13 = por %p3413_p8, %p3412_p9 }
 0xf06   : > { %p3410_p0 = pneg %p3409_p7 }
 0xf07   : > { %p3416_p4 = por %p3415_p6, %p3414_p13 }
 0xf09   : > { %p3417_p12 = pnand %p3416_p4, %p3410_p0 }
 0xf0b   : > { %3420 = shalt.err (!%p3417_p12)
}
 0xf0c   : > { %2902 = dma.vmem_to_hbm [thread:$0]  (%p4591_p1), %s2309_s30, 128, %s4376_s1, %s2295_s5  }
 0xf0d PF: > { %s4592_s16 = sld [smem:[#allocation34_spill]]  ;;  %s4593_s2 = sld [smem:[#allocation27_spill]] }
 0xf0e   : > { %s4594_s4 = sld [smem:[#allocation41_spill]] }
 0xf13   : > { %p2937_p3 = scmp.ge.s32.totalorder %s4592_s16, 2  ;;  %s2320_s12 = sand.u32 1, %s4593_s2  }
 0xf14   : > { %p4595_p5 = scmp.ne.s32.totalorder %s4594_s4, 0  ;;  %s2321_s21 = scalar_lea.sflag [#allocation6], %s2320_s12 }
 0xf16   : > { %p2931_p11 = pnand %p2937_p3, %p4595_p5 }
 0xf18   : > { %3486 = dma.done.wait (!%p2931_p11), %s2321_s21, 128  }
 0xf19   : > { %3488 = vsyncadd (!%p2931_p11), %s2321_s21, 4294967168  ;;  %s43_s1 = sadd.s32 1, %s4592_s16   ;;  %s4596_s24 = sld [smem:[#allocation25_spill]] }
 0xf1a   : > { %p40_p2 = scmp.ge.s32.totalorder %s43_s1, 6   ;;  %s4597_s25 = sld [smem:[#allocation26_spill]] }
 0xf1b   : > { %s4598_s26 = sld [smem:[#allocation38_spill]]  ;;  %s4599_s27 = sld [smem:[#allocation28_spill]] }
 0xf1c   : > { %s4600_s28 = sld [smem:[#allocation29_spill]]  ;;  %s4601_s29 = sld [smem:[#allocation40_spill]] }
 0xf1d   : > { %s4602_s0 = sld [smem:[#allocation32_spill]]  ;;  %s4603_s30 = sld [smem:[#allocation33_spill]] }
 0xf1e   : > { %s4604_s18 = sld [smem:[#allocation36_spill]]  ;;  %s4605_s19 = sld [smem:[#allocation37_spill]] }
 0xf1f   :  { %42 = sbr.rel (!%p40_p2) target bundleno = 35 (0x23), region = 235 }
 0xf26   :  { %2326 = vsyncpa [#allocation5], 1 }
 0xf27   :  { %2328 = vsyncpa [#allocation5 + $0x1], 1 }
 0xf28   :  { %2329 = vsyncpa [#allocation8], 1 }
 0xf29   :  { %2331 = vsyncpa [#allocation8 + $0x1], 1 }
 0xf2a   :  { %2332 = vsyncpa [#allocation11], 1 }
 0xf2b   :  { %2334 = vsyncpa [#allocation11 + $0x1], 1 }
 0xf2c   :  { %2335 = vsyncpa [#allocation14], 1 }
 0xf2d   :  { %2337 = vsyncpa [#allocation14 + $0x1], 1 }
 0xf2e   :  { %2338 = vsyncpa [#allocation17], 1 }
 0xf2f   :  { %2339 = vsyncpa [#allocation6], 1 }
 0xf30   :  { %2341 = vsyncpa [#allocation6 + $0x1], 1 }

</bundles_post_ra>
